<compile_context>
chip_gen: v6e
topology: v6e:2x2x1
jax: 0.10.0
libtpu: 0.0.40
codegen_flags: <defaults>
</compile_context>

<pallas_src>
import functools

import jax
import jax.numpy as jnp
from jax.experimental import pallas as pl
from jax.experimental.pallas import tpu as pltpu

D_IN = 28 * 28   # 784
D_H = 512
D_OUT = 10
N_PAD = 128      # lane-dense padded logit width


def _round_up(n: int, m: int) -> int:
    return -(-n // m) * m


def mlp_kernel(x_ref, w1_ref, b1_ref, w2_ref, b2_ref, w3_ref, b3_ref, o_ref):
    # x arrives as raw f32 (TB, 784); cast to bf16 on the VPU (free under MXU).
    x = x_ref[...].astype(jnp.bfloat16)

    # Layer 1: (TB, 784) @ (784, 512) + b1 -> ReLU   (bf16 in, f32 accumulate)
    h1 = jnp.dot(x, w1_ref[...], preferred_element_type=jnp.float32)
    h1 = jnp.maximum(h1 + b1_ref[...], 0.0).astype(jnp.bfloat16)

    # Layer 2: (TB, 512) @ (512, 512) + b2 -> ReLU
    h2 = jnp.dot(h1, w2_ref[...], preferred_element_type=jnp.float32)
    h2 = jnp.maximum(h2 + b2_ref[...], 0.0).astype(jnp.bfloat16)

    # Layer 3: (TB, 512) @ (512, 128-padded) + b3 -> lane-dense bf16 logit slab
    logits = jnp.dot(h2, w3_ref[...], preferred_element_type=jnp.float32)
    o_ref[...] = (logits + b3_ref[...]).astype(o_ref.dtype)


def prepare_params(params):
    """One-time conversion of f32 (in,out)/(1,out) params to the kernel layout:
    bf16 weights, f32 biases, W3/b3 padded to 128 output lanes.  Call once and
    reuse across forward calls (keeps weight prep out of the jitted hot path)."""
    w1, b1, w2, b2, w3, b3 = params
    w1p = w1.astype(jnp.bfloat16)                                    # (784, 512)
    w2p = w2.astype(jnp.bfloat16)                                    # (512, 512)
    w3p = jnp.pad(w3, ((0, 0), (0, N_PAD - D_OUT))).astype(jnp.bfloat16)  # (512, 128)
    b3p = jnp.pad(b3, ((0, 0), (0, N_PAD - D_OUT)))                  # f32 (1, 128)
    return tuple(jax.device_put(t) for t in (w1p, b1, w2p, b2, w3p, b3p))


@functools.partial(jax.jit, static_argnames=("tb",))
def neural_network_forward(x, prepared_params, *, tb=1024):
    """x: (B, 28, 28) float32. prepared_params: output of prepare_params().
    Returns logits (B, 10) float32."""
    w1, b1, w2, b2, w3, b3 = prepared_params
    B = x.shape[0]
    x_flat = x.reshape(B, D_IN)          # free reshape; stays f32, cast in-kernel

    # --- batch tiling: big tiles, but always >=2 grid steps when B > 16 so both
    #     v7x TensorCores get work.
    if B >= 2 * tb:
        TB = tb
    else:
        TB = max(16, _round_up(_round_up(B, 2) // 2, 16))   # round_up(ceil(B/2), 16)
    B_pad = _round_up(B, TB)
    if B_pad != B:
        x_flat = jnp.pad(x_flat, ((0, B_pad - B), (0, 0)))
    grid = (B_pad // TB,)

    flops = 2 * B_pad * (D_IN * D_H + D_H * D_H + D_H * N_PAD)
    bytes_accessed = (
        x_flat.size * 4                                   # f32 input, read once
        + (w1.size + w2.size + w3.size) * 2               # bf16 weights
        + (b1.size + b2.size + b3.size) * 4               # f32 biases
        + B_pad * N_PAD * 2                               # bf16 logit slab
    )

    out = pl.pallas_call(
        mlp_kernel,
        out_shape=jax.ShapeDtypeStruct((B_pad, N_PAD), jnp.bfloat16),
        grid_spec=pltpu.PrefetchScalarGridSpec(
            num_scalar_prefetch=0,
            grid=grid,
            in_specs=[
                # x tile marches with the grid (software-pipelined)...
                pl.BlockSpec((TB, D_IN), lambda i: (i, 0)),
                # ...weights/biases stay VMEM-resident (constant block index,
                #    DMA'd only once).
                pl.BlockSpec(w1.shape, lambda i: (0, 0)),
                pl.BlockSpec(b1.shape, lambda i: (0, 0)),
                pl.BlockSpec(w2.shape, lambda i: (0, 0)),
                pl.BlockSpec(b2.shape, lambda i: (0, 0)),
                pl.BlockSpec(w3.shape, lambda i: (0, 0)),
                pl.BlockSpec(b3.shape, lambda i: (0, 0)),
            ],
            out_specs=pl.BlockSpec((TB, N_PAD), lambda i: (i, 0)),
        ),
        compiler_params=pltpu.CompilerParams(
            dimension_semantics=("parallel",),   # shard batch steps across TCs (v7x)
        ),
        cost_estimate=pl.CostEstimate(
            flops=flops, transcendentals=0, bytes_accessed=bytes_accessed
        ),
    )(x_flat, w1, b1, w2, b2, w3, b3)

    return out[:B, :D_OUT].astype(jnp.float32)


def init_params(key):
    """Deterministic init matching nn.Linear shapes (stored as (in, out))."""
    k1, k2, k3 = jax.random.split(key, 3)

    def linear_init(k, fan_in, fan_out):
        # PyTorch default: U(-1/sqrt(fan_in), 1/sqrt(fan_in))
        bound = 1.0 / jnp.sqrt(fan_in)
        kw, kb = jax.random.split(k)
        w = jax.random.uniform(kw, (fan_in, fan_out), jnp.float32, -bound, bound)
        b = jax.random.uniform(kb, (1, fan_out), jnp.float32, -bound, bound)
        return w, b

    w1, b1 = linear_init(k1, D_IN, D_H)
    w2, b2 = linear_init(k2, D_H, D_H)
    w3, b3 = linear_init(k3, D_H, D_OUT)
    return (w1, b1, w2, b2, w3, b3)


def reference_forward_bf16(x, params):
    """Reference with the same bf16-weight / f32-accumulate / bf16-logit numerics."""
    w1, b1, w2, b2, w3, b3 = params
    h = x.reshape(x.shape[0], -1).astype(jnp.bfloat16)
    h = jnp.dot(h, w1.astype(jnp.bfloat16), preferred_element_type=jnp.float32) + b1
    h = jnp.maximum(h, 0.0).astype(jnp.bfloat16)
    h = jnp.dot(h, w2.astype(jnp.bfloat16), preferred_element_type=jnp.float32) + b2
    h = jnp.maximum(h, 0.0).astype(jnp.bfloat16)
    out = jnp.dot(h, w3.astype(jnp.bfloat16), preferred_element_type=jnp.float32) + b3
    return out.astype(jnp.bfloat16).astype(jnp.float32)


def reference_forward_f32(x, params):
    w1, b1, w2, b2, w3, b3 = params
    h = x.reshape(x.shape[0], -1)
    h = jnp.maximum(h @ w1 + b1, 0.0)
    h = jnp.maximum(h @ w2 + b2, 0.0)
    return h @ w3 + b3


if __name__ == "__main__":
    key = jax.random.PRNGKey(0)
    kx, kp = jax.random.split(key)

    B = 32
    x = jax.random.normal(kx, (B, 28, 28), dtype=jnp.float32)
    params = init_params(kp)
    prepared = prepare_params(params)   # one-time weight layout prep (outside hot path)

    # Small batch -> TB=16, grid=(2,): exercises the pipelined, two-step batch grid.
    logits = neural_network_forward(x, prepared)
    logits = jax.block_until_ready(logits)
    assert logits.shape == (B, D_OUT)
    assert logits.dtype == jnp.float32

    ref_bf16 = reference_forward_bf16(x, params)
    assert jnp.allclose(logits, ref_bf16, atol=2e-2, rtol=2e-2), \
        "mismatch vs bf16 reference"

    ref_f32 = reference_forward_f32(x, params)
    assert jnp.allclose(logits, ref_f32, atol=1e-1, rtol=1e-1), \
        "mismatch vs f32 reference"

    print("KERNEL_OK")
</pallas_src>

<mosaic_0001>
module attributes {stable_mosaic.version = 11 : i64} {
  func.func @mlp_kernel(%arg0: i32, %arg1: memref<16x784xf32, #tpu.memory_space<vmem>>, %arg2: memref<784x512xbf16, #tpu.memory_space<vmem>>, %arg3: memref<1x512xf32, #tpu.memory_space<vmem>>, %arg4: memref<512x512xbf16, #tpu.memory_space<vmem>>, %arg5: memref<1x512xf32, #tpu.memory_space<vmem>>, %arg6: memref<512x128xbf16, #tpu.memory_space<vmem>>, %arg7: memref<1x128xf32, #tpu.memory_space<vmem>>, %arg8: memref<16x128xbf16, #tpu.memory_space<vmem>>) attributes {dimension_semantics = [#tpu.dimension_semantics<parallel>], iteration_bounds = array<i64: 2>, scalar_prefetch = 0 : i64, scratch_operands = 0 : i64, tpu.core_type = #tpu.core_type<tc>, window_params = [{transform_indices = @transform_0, window_bounds = array<i64: 16, 784>}, {pipeline_mode = #tpu.pipeline_mode<synchronous>, transform_indices = @transform_1, window_bounds = array<i64: 784, 512>}, {pipeline_mode = #tpu.pipeline_mode<synchronous>, transform_indices = @transform_2, window_bounds = array<i64: 1, 512>}, {pipeline_mode = #tpu.pipeline_mode<synchronous>, transform_indices = @transform_3, window_bounds = array<i64: 512, 512>}, {pipeline_mode = #tpu.pipeline_mode<synchronous>, transform_indices = @transform_4, window_bounds = array<i64: 1, 512>}, {pipeline_mode = #tpu.pipeline_mode<synchronous>, transform_indices = @transform_5, window_bounds = array<i64: 512, 128>}, {pipeline_mode = #tpu.pipeline_mode<synchronous>, transform_indices = @transform_6, window_bounds = array<i64: 1, 128>}, {transform_indices = @transform_7, window_bounds = array<i64: 16, 128>}]} {
    %c0 = arith.constant 0 : index
    %c0_0 = arith.constant 0 : index
    %0 = vector.load %arg1[%c0, %c0_0] : memref<16x784xf32, #tpu.memory_space<vmem>>, vector<16x784xf32>
    %1 = arith.truncf %0 : vector<16x784xf32> to vector<16x784xbf16>
    %c0_1 = arith.constant 0 : index
    %c0_2 = arith.constant 0 : index
    %2 = vector.load %arg2[%c0_1, %c0_2] : memref<784x512xbf16, #tpu.memory_space<vmem>>, vector<784x512xbf16>
    %cst = arith.constant dense<0.000000e+00> : vector<16x512xf32>
    %3 = tpu.matmul %1, %2, %cst {dimension_numbers = #tpu.dot_dimension_numbers<[1], [0], [0], [1], [0, 0, 1, 1], [], []>} : vector<16x784xbf16>, vector<784x512xbf16>, vector<16x512xf32> -> vector<16x512xf32>
    %c0_3 = arith.constant 0 : index
    %c0_4 = arith.constant 0 : index
    %4 = vector.load %arg3[%c0_3, %c0_4] : memref<1x512xf32, #tpu.memory_space<vmem>>, vector<1x512xf32>
    %5 = vector.broadcast %4 : vector<1x512xf32> to vector<16x512xf32>
    %6 = arith.addf %3, %5 : vector<16x512xf32>
    %cst_5 = arith.constant 0.000000e+00 : f32
    %7 = vector.broadcast %cst_5 : f32 to vector<16x512xf32>
    %8 = arith.maximumf %6, %7 : vector<16x512xf32>
    %9 = arith.truncf %8 : vector<16x512xf32> to vector<16x512xbf16>
    %c0_6 = arith.constant 0 : index
    %c0_7 = arith.constant 0 : index
    %10 = vector.load %arg4[%c0_6, %c0_7] : memref<512x512xbf16, #tpu.memory_space<vmem>>, vector<512x512xbf16>
    %cst_8 = arith.constant dense<0.000000e+00> : vector<16x512xf32>
    %11 = tpu.matmul %9, %10, %cst_8 {dimension_numbers = #tpu.dot_dimension_numbers<[1], [0], [0], [1], [0, 0, 1, 1], [], []>} : vector<16x512xbf16>, vector<512x512xbf16>, vector<16x512xf32> -> vector<16x512xf32>
    %c0_9 = arith.constant 0 : index
    %c0_10 = arith.constant 0 : index
    %12 = vector.load %arg5[%c0_9, %c0_10] : memref<1x512xf32, #tpu.memory_space<vmem>>, vector<1x512xf32>
    %13 = vector.broadcast %12 : vector<1x512xf32> to vector<16x512xf32>
    %14 = arith.addf %11, %13 : vector<16x512xf32>
    %cst_11 = arith.constant 0.000000e+00 : f32
    %15 = vector.broadcast %cst_11 : f32 to vector<16x512xf32>
    %16 = arith.maximumf %14, %15 : vector<16x512xf32>
    %17 = arith.truncf %16 : vector<16x512xf32> to vector<16x512xbf16>
    %c0_12 = arith.constant 0 : index
    %c0_13 = arith.constant 0 : index
    %18 = vector.load %arg6[%c0_12, %c0_13] : memref<512x128xbf16, #tpu.memory_space<vmem>>, vector<512x128xbf16>
    %cst_14 = arith.constant dense<0.000000e+00> : vector<16x128xf32>
    %19 = tpu.matmul %17, %18, %cst_14 {dimension_numbers = #tpu.dot_dimension_numbers<[1], [0], [0], [1], [0, 0, 1, 1], [], []>} : vector<16x512xbf16>, vector<512x128xbf16>, vector<16x128xf32> -> vector<16x128xf32>
    %c0_15 = arith.constant 0 : index
    %c0_16 = arith.constant 0 : index
    %20 = vector.load %arg7[%c0_15, %c0_16] : memref<1x128xf32, #tpu.memory_space<vmem>>, vector<1x128xf32>
    %21 = vector.broadcast %20 : vector<1x128xf32> to vector<16x128xf32>
    %22 = arith.addf %19, %21 : vector<16x128xf32>
    %23 = arith.truncf %22 : vector<16x128xf32> to vector<16x128xbf16>
    %c0_17 = arith.constant 0 : index
    %c0_18 = arith.constant 0 : index
    %24 = vector.load %arg8[%c0_17, %c0_18] : memref<16x128xbf16, #tpu.memory_space<vmem>>, vector<16x128xbf16>
    tpu.vector_store %arg8[%c0_17, %c0_18], %23 {strides = array<i32>} : memref<16x128xbf16, #tpu.memory_space<vmem>>, vector<16x128xbf16>,
    return
  }
  func.func @transform_0(%arg0: i32) -> (i32, i32) {
    %c0_i32 = arith.constant 0 : i32
    %c0_i32_0 = arith.constant 0 : i32
    return %arg0, %c0_i32 : i32, i32
  }
  func.func @transform_1(%arg0: i32) -> (i32, i32) {
    %c0_i32 = arith.constant 0 : i32
    %c0_i32_0 = arith.constant 0 : i32
    %c0_i32_1 = arith.constant 0 : i32
    return %c0_i32, %c0_i32_0 : i32, i32
  }
  func.func @transform_2(%arg0: i32) -> (i32, i32) {
    %c0_i32 = arith.constant 0 : i32
    %c0_i32_0 = arith.constant 0 : i32
    %c0_i32_1 = arith.constant 0 : i32
    return %c0_i32, %c0_i32_0 : i32, i32
  }
  func.func @transform_3(%arg0: i32) -> (i32, i32) {
    %c0_i32 = arith.constant 0 : i32
    %c0_i32_0 = arith.constant 0 : i32
    %c0_i32_1 = arith.constant 0 : i32
    return %c0_i32, %c0_i32_0 : i32, i32
  }
  func.func @transform_4(%arg0: i32) -> (i32, i32) {
    %c0_i32 = arith.constant 0 : i32
    %c0_i32_0 = arith.constant 0 : i32
    %c0_i32_1 = arith.constant 0 : i32
    return %c0_i32, %c0_i32_0 : i32, i32
  }
  func.func @transform_5(%arg0: i32) -> (i32, i32) {
    %c0_i32 = arith.constant 0 : i32
    %c0_i32_0 = arith.constant 0 : i32
    %c0_i32_1 = arith.constant 0 : i32
    return %c0_i32, %c0_i32_0 : i32, i32
  }
  func.func @transform_6(%arg0: i32) -> (i32, i32) {
    %c0_i32 = arith.constant 0 : i32
    %c0_i32_0 = arith.constant 0 : i32
    %c0_i32_1 = arith.constant 0 : i32
    return %c0_i32, %c0_i32_0 : i32, i32
  }
  func.func @transform_7(%arg0: i32) -> (i32, i32) {
    %c0_i32 = arith.constant 0 : i32
    %c0_i32_0 = arith.constant 0 : i32
    return %arg0, %c0_i32 : i32, i32
  }
}

</mosaic_0001>

<bundles_post_ra>
// kernel: neural_network_forward.1
= control target key start
LH: loop header
LB: loop body
LE: loop exit
PB: predicated region body
PF: predicated region fallthrough
CT: control target
= control target key end

     0   :  { %s4250_s24 = smov 0   ;;  %s5434_s0 = inlined_call_operand.vmem [shape: f32[32,784], index: 0, kind: input, shape index: {}]   ;;  %s5435_s1 = inlined_call_operand.vmem [shape: bf16[784,512], index: 1, kind: input, shape index: {}]   ;;  %s5436_s2 = inlined_call_operand.vmem [shape: f32[1,512], index: 2, kind: input, shape index: {}]   ;;  %s5437_s3 = inlined_call_operand.vmem [shape: bf16[512,512], index: 3, kind: input, shape index: {}]   ;;  %s5438_s4 = inlined_call_operand.vmem [shape: f32[1,512], index: 4, kind: input, shape index: {}]   ;;  %s5439_s5 = inlined_call_operand.vmem [shape: bf16[512,128], index: 5, kind: input, shape index: {}]   ;;  %s5440_s6 = inlined_call_operand.vmem [shape: f32[1,128], index: 6, kind: input, shape index: {}]   ;;  %s5441_s7 = inlined_call_operand.vmem [shape: bf16[32,128], index: 7, kind: output, shape index: {}]  }
   0x1 LB: > { %s3250_s25 = sadd.s32 4294967295, %s4207_s24   ;;  %p3254_p0 = scmp.ge.s32.totalorder %s4207_s24, 1  ;;  %s4207_s24 = sphi %s4250_s24, %s17_s24  }
   0x2   : > { %p239_p1 = scmp.lt.s32.totalorder %s4207_s24, 3 }
   0x4   : > { %p240_p2 = pnand %p3254_p0, %p239_p1 }
   0x5   : > { %s3255_s19 = sshll.u32 (!%p240_p2), %s3250_s25, 1 }
   0x6   : > { %243 = sbr.rel (%p240_p2) target bundleno = 897 (0x381), region = 48  ;;  %p273_p3 = scmp.lt.s32.totalorder (!%p240_p2), %s3255_s19, 3 }
   0xb   : > { %v3683_v0 = vld [vmem:[%s5435_s1 + $0xe4] ss:$16 sps:$4 sm:$0xff]   ;;  %v3687_v2 = vld [vmem:[%s5435_s1 + $0xe0] ss:$16 sps:$4 sm:$0xff]   ;;  %s5443_s19 = smov (!%p273_p3, %s3255_s19), 3  ;;  %vm1505_vm0 = vcmask 130048  }
   0xc   : > { %v3685_v1 = vld [vmem:[%s5435_s1 + $0x2e4] ss:$16 sps:$4 sm:$0xff]   ;;  %1509 = vmatprep.subr.bf16.mxu0 %v3683_v0  ;;  %v3688_v3 = vld [vmem:[%s5435_s1 + $0x2e0] ss:$16 sps:$4 sm:$0xff]   ;;  %s3673_s18 = smul.u32 56, %s5443_s19  ;;  %s3258_s20 = sshll.u32 %s5443_s19, 2 }
   0xd   : > { %1552 = vmatprep.subr.bf16.mxu1 %v3685_v1  ;;  %v3689_v4 = vld [vmem:[%s5435_s1 + $0xc4] ss:$16 sps:$4 sm:$0xff]   ;;  %1510 = vmatpush1.bf16.msra.mxu0 %v3687_v2  ;;  %v3693_v6 = vld [vmem:[%s5435_s1 + $0xc0] ss:$16 sps:$4 sm:$0xff]  }
   0xe   : > { %1553 = vmatpush1.bf16.msra.mxu1 %v3688_v3  ;;  %v3691_v5 = vld [vmem:[%s5435_s1 + $0x2c4] ss:$16 sps:$4 sm:$0xff]   ;;  %1511 = vmatprep.subr.bf16.mxu0 %v3689_v4  ;;  %v3694_v7 = vld [vmem:[%s5435_s1 + $0x2c0] ss:$16 sps:$4 sm:$0xff]   ;;  %s4398_s10 = scalar_lea.vmem %s5434_s0, %s3673_s18 }
   0xf   : > { %1554 = vmatprep.subr.bf16.mxu1 %v3691_v5  ;;  %v3695_v8 = vld [vmem:[%s5435_s1 + $0xa4] ss:$16 sps:$4 sm:$0xff]   ;;  %v3699_v10 = vld [vmem:[%s5435_s1 + $0xa0] ss:$16 sps:$4 sm:$0xff]   ;;  %v287_v46 = vld [vmem:[%s4398_s10 + $0x8] sm:$0xff] }
  0x10   : > { %v3697_v9 = vld [vmem:[%s5435_s1 + $0x2a4] ss:$16 sps:$4 sm:$0xff]   ;;  %v3700_v11 = vld [vmem:[%s5435_s1 + $0x2a0] ss:$16 sps:$4 sm:$0xff]   ;;  %v289_v48 = vld [vmem:[%s4398_s10 + $0x18] sm:$0xff] }
  0x11   : > { %1512 = vmatpush1.bf16.msra.mxu0 %v3693_v6  ;;  %v3701_v12 = vld [vmem:[%s5435_s1 + $0x84] ss:$16 sps:$4 sm:$0xff]   ;;  %v3705_v14 = vld [vmem:[%s5435_s1 + $0x80] ss:$16 sps:$4 sm:$0xff]  }
  0x12   : > { %1555 = vmatpush1.bf16.msra.mxu1 %v3694_v7  ;;  %1513 = vmatprep.subr.bf16.mxu0 %v3695_v8  ;;  %v3703_v13 = vld [vmem:[%s5435_s1 + $0x284] ss:$16 sps:$4 sm:$0xff]   ;;  %v3706_v15 = vld [vmem:[%s5435_s1 + $0x280] ss:$16 sps:$4 sm:$0xff]   ;;  %v293_v7 = vld [vmem:[%s4398_s10 + $0x38] sm:$0xff] }
  0x13   : > { %1556 = vmatprep.subr.bf16.mxu1 %v3697_v9  ;;  %v3707_v16 = vld [vmem:[%s5435_s1 + $0x64] ss:$16 sps:$4 sm:$0xff]   ;;  %v3711_v18 = vld [vmem:[%s5435_s1 + $0x60] ss:$16 sps:$4 sm:$0xff]   ;;  %v295_v9 = vld [vmem:[%s4398_s10 + $0x48] sm:$0xff] }
  0x14   : > { %v3709_v17 = vld [vmem:[%s5435_s1 + $0x264] ss:$16 sps:$4 sm:$0xff]   ;;  %v3712_v19 = vld [vmem:[%s5435_s1 + $0x260] ss:$16 sps:$4 sm:$0xff]  }
  0x15   : > { %1514 = vmatpush1.bf16.msra.mxu0 %v3699_v10  ;;  %v3713_v20 = vld [vmem:[%s5435_s1 + $0x44] ss:$16 sps:$4 sm:$0xff]   ;;  %v3717_v22 = vld [vmem:[%s5435_s1 + $0x40] ss:$16 sps:$4 sm:$0xff]  }
  0x16   : > { %1557 = vmatpush1.bf16.msra.mxu1 %v3700_v11  ;;  %1515 = vmatprep.subr.bf16.mxu0 %v3701_v12  ;;  %v3715_v21 = vld [vmem:[%s5435_s1 + $0x244] ss:$16 sps:$4 sm:$0xff]   ;;  %v3718_v23 = vld [vmem:[%s5435_s1 + $0x240] ss:$16 sps:$4 sm:$0xff]  }
  0x17   : > { %1558 = vmatprep.subr.bf16.mxu1 %v3703_v13  ;;  %v3719_v24 = vld [vmem:[%s5435_s1 + $0x24] ss:$16 sps:$4 sm:$0xff]   ;;  %v3723_v26 = vld [vmem:[%s5435_s1 + $0x20] ss:$16 sps:$4 sm:$0xff]  }
  0x18   : > { %v3721_v25 = vld [vmem:[%s5435_s1 + $0x224] ss:$16 sps:$4 sm:$0xff]   ;;  %v3724_v27 = vld [vmem:[%s5435_s1 + $0x220] ss:$16 sps:$4 sm:$0xff]  }
  0x19   : > { %1516 = vmatpush1.bf16.msra.mxu0 %v3705_v14  ;;  %v3725_v28 = vld [vmem:[%s5435_s1 + $0x4] ss:$16 sps:$4 sm:$0xff]   ;;  %v3729_v30 = vld [vmem:[%s5435_s1] ss:$16 sps:$4 sm:$0xff]  }
  0x1a   : > { %1559 = vmatpush1.bf16.msra.mxu1 %v3706_v15  ;;  %1517 = vmatprep.subr.bf16.mxu0 %v3707_v16  ;;  %v3727_v29 = vld [vmem:[%s5435_s1 + $0x204] ss:$16 sps:$4 sm:$0xff]   ;;  %v3730_v31 = vld [vmem:[%s5435_s1 + $0x200] ss:$16 sps:$4 sm:$0xff]  }
  0x1b   : > { %1560 = vmatprep.subr.bf16.mxu1 %v3709_v17  ;;  %v3731_v32 = vld [vmem:[%s5435_s1 + $0x1e4] ss:$16 sps:$4 sm:$0xff]   ;;  %v3735_v34 = vld [vmem:[%s5435_s1 + $0x1e0] ss:$16 sps:$4 sm:$0xff]   ;;  %v3790_v17 = vld [vmem:[%s5435_s1 + $0xec] ss:$16 sps:$4 sm:$0xff]  }
  0x1c   : > { %v3733_v33 = vld [vmem:[%s5435_s1 + $0x3e4] ss:$16 sps:$4 sm:$0xff]   ;;  %v3736_v35 = vld [vmem:[%s5435_s1 + $0x3e0] ss:$16 sps:$4 sm:$0xff]  }
  0x1d   : > { %1518 = vmatpush1.bf16.msra.mxu0 %v3711_v18  ;;  %v3737_v36 = vld [vmem:[%s5435_s1 + $0x1c4] ss:$16 sps:$4 sm:$0xff]   ;;  %v3741_v38 = vld [vmem:[%s5435_s1 + $0x1c0] ss:$16 sps:$4 sm:$0xff]  }
  0x1e   : > { %1561 = vmatpush1.bf16.msra.mxu1 %v3712_v19  ;;  %1519 = vmatprep.subr.bf16.mxu0 %v3713_v20  ;;  %v3739_v37 = vld [vmem:[%s5435_s1 + $0x3c4] ss:$16 sps:$4 sm:$0xff]   ;;  %v3742_v39 = vld [vmem:[%s5435_s1 + $0x3c0] ss:$16 sps:$4 sm:$0xff]   ;;  %v299_v20 = vld [vmem:[%s4398_s10 + $0x68] sm:$0xff] }
  0x1f   : > { %1562 = vmatprep.subr.bf16.mxu1 %v3715_v21  ;;  %v3743_v40 = vld [vmem:[%s5435_s1 + $0x1a4] ss:$16 sps:$4 sm:$0xff]   ;;  %v3747_v42 = vld [vmem:[%s5435_s1 + $0x1a0] ss:$16 sps:$4 sm:$0xff]   ;;  %v4209_v21 = vmov 0  }
  0x20   : > { %v3745_v41 = vld [vmem:[%s5435_s1 + $0x3a4] ss:$16 sps:$4 sm:$0xff]   ;;  %v3748_v43 = vld [vmem:[%s5435_s1 + $0x3a0] ss:$16 sps:$4 sm:$0xff]  }
  0x21   : > { %1520 = vmatpush1.bf16.msra.mxu0 %v3717_v22  ;;  %v3749_v44 = vld [vmem:[%s5435_s1 + $0x184] ss:$16 sps:$4 sm:$0xff]   ;;  %v3753_v50 = vld [vmem:[%s5435_s1 + $0x180] ss:$16 sps:$4 sm:$0xff]  }
  0x22   : > { %1563 = vmatpush1.bf16.msra.mxu1 %v3718_v23  ;;  %1521 = vmatprep.subr.bf16.mxu0 %v3719_v24  ;;  %v3751_v45 = vld [vmem:[%s5435_s1 + $0x384] ss:$16 sps:$4 sm:$0xff]   ;;  %v3754_v51 = vld [vmem:[%s5435_s1 + $0x380] ss:$16 sps:$4 sm:$0xff]   ;;  %v3788_v24 = vld [vmem:[%s5435_s1 + $0xe8] ss:$16 sps:$4 sm:$0xff]  }
  0x23   : > { %1564 = vmatprep.subr.bf16.mxu1 %v3721_v25  ;;  %v294_v47 = vld [vmem:[%s4398_s10 + $0x40] sm:$0xff]  ;;  %v296_v49 = vld [vmem:[%s4398_s10 + $0x50] sm:$0xff] }
  0x24   : > { %v3755_v52 = vld [vmem:[%s5435_s1 + $0x164] ss:$16 sps:$4 sm:$0xff]   ;;  %v4419_v53 = vpack.c.bf16 %v294_v47, %v287_v46  ;;  %v4421_v54 = vpack.c.bf16 %v296_v49, %v289_v48  ;;  %v3759_v56 = vld [vmem:[%s5435_s1 + $0x160] ss:$16 sps:$4 sm:$0xff]   ;;  %v3818_v47 = vld [vmem:[%s5435_s1 + $0x48] ss:$16 sps:$4 sm:$0xff]  }
  0x25   : > { %1522 = vmatpush1.bf16.msra.mxu0 %v3723_v26  ;;  %v3757_v55 = vld [vmem:[%s5435_s1 + $0x364] ss:$16 sps:$4 sm:$0xff]   ;;  %v3760_v57 = vld [vmem:[%s5435_s1 + $0x360] ss:$16 sps:$4 sm:$0xff]   ;;  %v3796_v26 = vld [vmem:[%s5435_s1 + $0xcc] ss:$16 sps:$4 sm:$0xff]  }
  0x26   : > { %1565 = vmatpush1.bf16.msra.mxu1 %v3724_v27  ;;  %1523 = vmatprep.subr.bf16.mxu0 %v3725_v28  ;;  %v3761_v58 = vld [vmem:[%s5435_s1 + $0x144] ss:$16 sps:$4 sm:$0xff]   ;;  %v3765_v60 = vld [vmem:[%s5435_s1 + $0x140] ss:$16 sps:$4 sm:$0xff]   ;;  %v3794_v28 = vld [vmem:[%s5435_s1 + $0xc8] ss:$16 sps:$4 sm:$0xff]  }
  0x27   : > { %1566 = vmatprep.subr.bf16.mxu1 %v3727_v29  ;;  %1541 = vmatprep.mubr.bf16.mxu0 %v4419_v53  ;;  %v3763_v59 = vld [vmem:[%s5435_s1 + $0x344] ss:$16 sps:$4 sm:$0xff]   ;;  %v3766_v61 = vld [vmem:[%s5435_s1 + $0x340] ss:$16 sps:$4 sm:$0xff]   ;;  %v3826_v49 = vld [vmem:[%s5435_s1 + $0x2c] ss:$16 sps:$4 sm:$0xff]  }
  0x28   : > { %1584 = vmatprep.mubr.bf16.mxu1 %v4421_v54  ;;  %v3767_v62 = vld [vmem:[%s5435_s1 + $0x124] ss:$16 sps:$4 sm:$0xff]   ;;  %v3771_v0 = vld [vmem:[%s5435_s1 + $0x120] ss:$16 sps:$4 sm:$0xff]  }
  0x29   : > { %1524 = vmatpush1.bf16.msra.mxu0 %v3729_v30  ;;  %v3769_v63 = vld [vmem:[%s5435_s1 + $0x324] ss:$16 sps:$4 sm:$0xff]   ;;  %v3772_v1 = vld [vmem:[%s5435_s1 + $0x320] ss:$16 sps:$4 sm:$0xff]   ;;  %v3802_v30 = vld [vmem:[%s5435_s1 + $0xac] ss:$16 sps:$4 sm:$0xff]  }
  0x2a   : > { %1567 = vmatpush1.bf16.msra.mxu1 %v3730_v31  ;;  %1525 = vmatprep.subr.bf16.mxu0 %v3731_v32  ;;  %v3773_v2 = vld [vmem:[%s5435_s1 + $0x104] ss:$16 sps:$4 sm:$0xff]   ;;  %v3777_v4 = vld [vmem:[%s5435_s1 + $0x100] ss:$16 sps:$4 sm:$0xff]   ;;  %v3800_v32 = vld [vmem:[%s5435_s1 + $0xa8] ss:$16 sps:$4 sm:$0xff]  }
  0x2b   : > { %1568 = vmatprep.subr.bf16.mxu1 %v3733_v33  ;;  %v3775_v3 = vld [vmem:[%s5435_s1 + $0x304] ss:$16 sps:$4 sm:$0xff]   ;;  %v3778_v5 = vld [vmem:[%s5435_s1 + $0x300] ss:$16 sps:$4 sm:$0xff]  }
  0x2c   : > { %v286_v6 = vld [vmem:[%s4398_s10] sm:$0xff]  ;;  %v288_v8 = vld [vmem:[%s4398_s10 + $0x10] sm:$0xff] }
  0x2d   : > { %1526 = vmatpush2.bf16.msra.mxu0 %v3735_v34  ;;  %v3781_v10 = vld [vmem:[%s5435_s1 + $0x4e4] ss:$16 sps:$4 sm:$0xff]   ;;  %v4480_v12 = vpack.c.bf16 %v293_v7, %v286_v6  ;;  %v4482_v13 = vpack.c.bf16 %v295_v9, %v288_v8  ;;  %v3779_v14 = vld [vmem:[%s5435_s1 + $0x4e0] ss:$16 sps:$4 sm:$0xff]   ;;  %v3808_v34 = vld [vmem:[%s5435_s1 + $0x8c] ss:$16 sps:$4 sm:$0xff]  }
  0x2e   : > { %1569 = vmatpush2.bf16.msra.mxu1 %v3736_v35  ;;  %1527 = vmatprep.subr.bf16.mxu0 %v3737_v36  ;;  %v3784_v11 = vld [vmem:[%s5435_s1 + $0x604] ss:$16 sps:$4 sm:$0xff]   ;;  %v3782_v15 = vld [vmem:[%s5435_s1 + $0x600] ss:$16 sps:$4 sm:$0xff]   ;;  %v3806_v36 = vld [vmem:[%s5435_s1 + $0x88] ss:$16 sps:$4 sm:$0xff]  }
  0x2f   : > { %1570 = vmatprep.subr.bf16.mxu1 %v3739_v37  ;;  %v3787_v16 = vld [vmem:[%s5435_s1 + $0x4c4] ss:$16 sps:$4 sm:$0xff]   ;;  %v3785_v18 = vld [vmem:[%s5435_s1 + $0x4c0] ss:$16 sps:$4 sm:$0xff]   ;;  %v3856_v6 = vld [vmem:[%s5435_s1 + $0x18c] ss:$16 sps:$4 sm:$0xff]  }
  0x30   : > { %v292_v19 = vld [vmem:[%s4398_s10 + $0x30] sm:$0xff]  ;;  %v3854_v8 = vld [vmem:[%s5435_s1 + $0x188] ss:$16 sps:$4 sm:$0xff]  }
  0x31   : > { %1528 = vmatpush2.bf16.msra.mxu0 %v3741_v38  ;;  %v3793_v22 = vld [vmem:[%s5435_s1 + $0x4a4] ss:$16 sps:$4 sm:$0xff]   ;;  %v4507_v23 = vpack.c.bf16 %v299_v20, %v292_v19  ;;  %v3791_v25 = vld [vmem:[%s5435_s1 + $0x4a0] ss:$16 sps:$4 sm:$0xff]   ;;  %v3814_v38 = vld [vmem:[%s5435_s1 + $0x6c] ss:$16 sps:$4 sm:$0xff]  }
  0x32   : > { %1571 = vmatpush2.bf16.msra.mxu1 %v3742_v39  ;;  %1529 = vmatprep.subr.bf16.mxu0 %v3743_v40  ;;  %v3799_v27 = vld [vmem:[%s5435_s1 + $0x484] ss:$16 sps:$4 sm:$0xff]   ;;  %v3797_v29 = vld [vmem:[%s5435_s1 + $0x480] ss:$16 sps:$4 sm:$0xff]   ;;  %v3812_v40 = vld [vmem:[%s5435_s1 + $0x68] ss:$16 sps:$4 sm:$0xff]  }
  0x33   : > { %1572 = vmatprep.subr.bf16.mxu1 %v3745_v41  ;;  %v3805_v31 = vld [vmem:[%s5435_s1 + $0x464] ss:$16 sps:$4 sm:$0xff]   ;;  %v3803_v33 = vld [vmem:[%s5435_s1 + $0x460] ss:$16 sps:$4 sm:$0xff]   ;;  %v291_v41 = vld [vmem:[%s4398_s10 + $0x28] sm:$0xff] }
  0x34   : > { %v3811_v35 = vld [vmem:[%s5435_s1 + $0x444] ss:$16 sps:$4 sm:$0xff]   ;;  %v3809_v37 = vld [vmem:[%s5435_s1 + $0x440] ss:$16 sps:$4 sm:$0xff]  }
  0x35   : > { %1530 = vmatpush2.bf16.msra.mxu0 %v3747_v42  ;;  %v3817_v39 = vld [vmem:[%s5435_s1 + $0x424] ss:$16 sps:$4 sm:$0xff]   ;;  %v3821_v48 = vld [vmem:[%s5435_s1 + $0x400] ss:$16 sps:$4 sm:$0xff]  }
  0x36   : > { %1573 = vmatpush2.bf16.msra.mxu1 %v3748_v43  ;;  %1531 = vmatprep.subr.bf16.mxu0 %v3749_v44  ;;  %v298_v42 = vld [vmem:[%s4398_s10 + $0x60] sm:$0xff] }
  0x37   : > { %1574 = vmatprep.subr.bf16.mxu1 %v3751_v45  ;;  %v3815_v43 = vld [vmem:[%s5435_s1 + $0x420] ss:$16 sps:$4 sm:$0xff]   ;;  %v4568_v44 = vpack.c.bf16 %v298_v42, %v291_v41  ;;  %v3820_v45 = vld [vmem:[%s5435_s1 + $0x4c] ss:$16 sps:$4 sm:$0xff]   ;;  %v3823_v46 = vld [vmem:[%s5435_s1 + $0x404] ss:$16 sps:$4 sm:$0xff]  }
  0x38   : > { %v3859_v7 = vld [vmem:[%s5435_s1 + $0x544] ss:$16 sps:$4 sm:$0xff]   ;;  %v3857_v9 = vld [vmem:[%s5435_s1 + $0x540] ss:$16 sps:$4 sm:$0xff]   ;;  %v3901_v41 = vld [vmem:[%s5435_s1 + $0x26c] ss:$16 sps:$4 sm:$0xff]  }
  0x39   : > { %1532 = vmatpush2.bf16.msra.mxu0 %v3753_v50  ;;  %v3829_v50 = vld [vmem:[%s5435_s1 + $0x5e4] ss:$16 sps:$4 sm:$0xff]   ;;  %v3869_v19 = vld [vmem:[%s5435_s1 + $0x500] ss:$16 sps:$4 sm:$0xff]   ;;  %v3896_v42 = vld [vmem:[%s5435_s1 + $0x4a8] ss:$16 sps:$4 sm:$0xff]  }
  0x3a   : > { %1575 = vmatpush2.bf16.msra.mxu1 %v3754_v51  ;;  %1533 = vmatprep.subr.bf16.mxu0 %v3755_v52  ;;  %v3824_v51 = vld [vmem:[%s5435_s1 + $0x28] ss:$16 sps:$4 sm:$0xff]   ;;  %v3827_v52 = vld [vmem:[%s5435_s1 + $0x5e0] ss:$16 sps:$4 sm:$0xff]  }
  0x3b   : > { %1576 = vmatprep.subr.bf16.mxu1 %v3757_v55  ;;  %v3835_v55 = vld [vmem:[%s5435_s1 + $0x5c4] ss:$16 sps:$4 sm:$0xff]  }
  0x3c   : > { %v290_v20 = vld [vmem:[%s4398_s10 + $0x20] sm:$0xff] }
  0x3d   : > { %1534 = vmatpush2.bf16.msra.mxu0 %v3759_v56  ;;  %v3830_v56 = vld [vmem:[%s5435_s1 + $0x8] ss:$16 sps:$4 sm:$0xff]  }
  0x3e   : > { %1577 = vmatpush2.bf16.msra.mxu1 %v3760_v57  ;;  %1535 = vmatprep.subr.bf16.mxu0 %v3761_v58  ;;  %v3833_v57 = vld [vmem:[%s5435_s1 + $0x5c0] ss:$16 sps:$4 sm:$0xff]   ;;  %v3838_v58 = vld [vmem:[%s5435_s1 + $0x1ec] ss:$16 sps:$4 sm:$0xff]  }
  0x3f   : > { %1578 = vmatprep.subr.bf16.mxu1 %v3763_v59  ;;  %v3841_v59 = vld [vmem:[%s5435_s1 + $0x5a4] ss:$16 sps:$4 sm:$0xff]  }
  0x41   : > { %1536 = vmatpush2.bf16.msra.mxu0 %v3765_v60  ;;  %v3836_v60 = vld [vmem:[%s5435_s1 + $0x1e8] ss:$16 sps:$4 sm:$0xff]  }
  0x42   : > { %1579 = vmatpush2.bf16.msra.mxu1 %v3766_v61  ;;  %1537 = vmatprep.subr.bf16.mxu0 %v3767_v62  ;;  %v3839_v61 = vld [vmem:[%s5435_s1 + $0x5a0] ss:$16 sps:$4 sm:$0xff]   ;;  %v3844_v62 = vld [vmem:[%s5435_s1 + $0x1cc] ss:$16 sps:$4 sm:$0xff]  }
  0x43   : > { %1580 = vmatprep.subr.bf16.mxu1 %v3769_v63  ;;  %v3847_v63 = vld [vmem:[%s5435_s1 + $0x584] ss:$16 sps:$4 sm:$0xff]  }
  0x45   : > { %1538 = vmatpush2.bf16.msra.mxu0 %v3771_v0  ;;  %v3842_v0 = vld [vmem:[%s5435_s1 + $0x1c8] ss:$16 sps:$4 sm:$0xff]  }
  0x46   : > { %1581 = vmatpush2.bf16.msra.mxu1 %v3772_v1  ;;  %1539 = vmatprep.subr.bf16.mxu0 %v3773_v2  ;;  %v3845_v1 = vld [vmem:[%s5435_s1 + $0x580] ss:$16 sps:$4 sm:$0xff]   ;;  %v3850_v2 = vld [vmem:[%s5435_s1 + $0x1ac] ss:$16 sps:$4 sm:$0xff]  }
  0x47   : > { %1582 = vmatprep.subr.bf16.mxu1 %v3775_v3  ;;  %v3853_v3 = vld [vmem:[%s5435_s1 + $0x564] ss:$16 sps:$4 sm:$0xff]  }
  0x49   : > { %1540 = vmatpush2.bf16.msra.mxu0 %v3777_v4  ;;  %v3848_v4 = vld [vmem:[%s5435_s1 + $0x1a8] ss:$16 sps:$4 sm:$0xff]  }
  0x4a   : > { %1583 = vmatpush2.bf16.msra.mxu1 %v3778_v5  ;;  %1595 = vmatprep.subr.bf16.mxu0 %v3781_v10  ;;  %v3851_v5 = vld [vmem:[%s5435_s1 + $0x560] ss:$16 sps:$4 sm:$0xff]   ;;  %v3862_v10 = vld [vmem:[%s5435_s1 + $0x16c] ss:$16 sps:$4 sm:$0xff]  }
  0x4b   : > { %1652 = vmatprep.subr.bf16.mxu1 %v3784_v11  ;;  %v3865_v11 = vld [vmem:[%s5435_s1 + $0x524] ss:$16 sps:$4 sm:$0xff]  }
  0x4c   : > { %1542 = vmatmul.mubr.bf16.vlgmr.msra.gmra.mxu0 %v4480_v12 }
  0x4d   : > { %1585 = vmatmul.mubr.bf16.vlgmr.msra.gmra.mxu1 %v4482_v13  ;;  %1596 = vmatpush1.bf16.msra.mxu0 %v3779_v14  ;;  %v3860_v14 = vld [vmem:[%s5435_s1 + $0x168] ss:$16 sps:$4 sm:$0xff]  }
  0x4e   : > { %1653 = vmatpush1.bf16.msra.mxu1 %v3782_v15  ;;  %1597 = vmatprep.subr.bf16.mxu0 %v3787_v16  ;;  %v3863_v15 = vld [vmem:[%s5435_s1 + $0x520] ss:$16 sps:$4 sm:$0xff]   ;;  %v3868_v16 = vld [vmem:[%s5435_s1 + $0x14c] ss:$16 sps:$4 sm:$0xff]  }
  0x4f   : > { %1670 = vmatprep.mubr.bf16.mxu1 %v4209_v21  ;;  %1681 = vmatprep.subr.bf16.mxu1 %v3790_v17  ;;  %v3871_v17 = vld [vmem:[%s5435_s1 + $0x504] ss:$16 sps:$4 sm:$0xff]  }
  0x50   : > { %1627 = vmatprep.mubr.bf16.mxu0 %v4568_v44 }
  0x51   : > { %1598 = vmatpush1.bf16.msra.mxu0 %v3785_v18  ;;  %v3866_v18 = vld [vmem:[%s5435_s1 + $0x148] ss:$16 sps:$4 sm:$0xff]  }
  0x52   : > { %1599 = vmatprep.subr.bf16.mxu0 %v3793_v22  ;;  %v297_v22 = vld [vmem:[%s4398_s10 + $0x58] sm:$0xff]  ;;  %s283_s10 = scalar_lea.vmem %s5441_s7, %s3258_s20 }
  0x55   : > { %3455 = vmatmul.mubr.msk.bf16.vlgmr.msra.gmra.mxu1 %vm1505_vm0, %v4507_v23  ;;  %1600 = vmatpush1.bf16.msra.mxu0 %v3791_v25  ;;  %v3877_v25 = vld [vmem:[%s5435_s1 + $0x2ec] ss:$16 sps:$4 sm:$0xff]  }
  0x56   : > { %1682 = vmatpush1.bf16.msra.mxu1 %v3788_v24  ;;  %1601 = vmatprep.subr.bf16.mxu0 %v3799_v27  ;;  %v3874_v24 = vld [vmem:[%s5435_s1 + $0x12c] ss:$16 sps:$4 sm:$0xff]   ;;  %v3872_v27 = vld [vmem:[%s5435_s1 + $0x128] ss:$16 sps:$4 sm:$0xff]  }
  0x57   : > { %1683 = vmatprep.subr.bf16.mxu1 %v3796_v26  ;;  %1713 = vmatprep.mubr.bf16.mxu1 %v4419_v53  ;;  %v3832_v53 = vld [vmem:[%s5435_s1 + $0xc] ss:$16 sps:$4 sm:$0xff]   ;;  %v4687_v26 = vpack.c.bf16 %v297_v22, %v290_v20  ;;  %v3956_v20 = vld [vmem:[%s5435_s1 + $0x568] ss:$16 sps:$4 sm:$0xff]  }
  0x58   : > { %v3959_v22 = vld [vmem:[%s5435_s1 + $0x328] ss:$16 sps:$4 sm:$0xff]  }
  0x59   : > { %1602 = vmatpush1.bf16.msra.mxu0 %v3797_v29  ;;  %v3880_v29 = vld [vmem:[%s5435_s1 + $0x10c] ss:$16 sps:$4 sm:$0xff]  }
  0x5a   : > { %1684 = vmatpush1.bf16.msra.mxu1 %v3794_v28  ;;  %1603 = vmatprep.subr.bf16.mxu0 %v3805_v31  ;;  %v3875_v28 = vld [vmem:[%s5435_s1 + $0x2e8] ss:$16 sps:$4 sm:$0xff]  }
  0x5b   : > { %1685 = vmatprep.subr.bf16.mxu1 %v3802_v30  ;;  %v3883_v30 = vld [vmem:[%s5435_s1 + $0x2cc] ss:$16 sps:$4 sm:$0xff]   ;;  %v3878_v31 = vld [vmem:[%s5435_s1 + $0x108] ss:$16 sps:$4 sm:$0xff]  }
  0x5d   : > { %1604 = vmatpush1.bf16.msra.mxu0 %v3803_v33  ;;  %v3886_v33 = vld [vmem:[%s5435_s1 + $0x4ec] ss:$16 sps:$4 sm:$0xff]  }
  0x5e   : > { %1686 = vmatpush1.bf16.msra.mxu1 %v3800_v32  ;;  %1605 = vmatprep.subr.bf16.mxu0 %v3811_v35  ;;  %v3881_v32 = vld [vmem:[%s5435_s1 + $0x2c8] ss:$16 sps:$4 sm:$0xff]  }
  0x5f   : > { %1687 = vmatprep.subr.bf16.mxu1 %v3808_v34  ;;  %v3889_v34 = vld [vmem:[%s5435_s1 + $0x2ac] ss:$16 sps:$4 sm:$0xff]   ;;  %v3884_v35 = vld [vmem:[%s5435_s1 + $0x4e8] ss:$16 sps:$4 sm:$0xff]  }
  0x61   : > { %1606 = vmatpush1.bf16.msra.mxu0 %v3809_v37  ;;  %v3892_v37 = vld [vmem:[%s5435_s1 + $0x4cc] ss:$16 sps:$4 sm:$0xff]  }
  0x62   : > { %1688 = vmatpush1.bf16.msra.mxu1 %v3806_v36  ;;  %1607 = vmatprep.subr.bf16.mxu0 %v3817_v39  ;;  %v3887_v36 = vld [vmem:[%s5435_s1 + $0x2a8] ss:$16 sps:$4 sm:$0xff]  }
  0x63   : > { %1689 = vmatprep.subr.bf16.mxu1 %v3814_v38  ;;  %v3895_v38 = vld [vmem:[%s5435_s1 + $0x28c] ss:$16 sps:$4 sm:$0xff]   ;;  %v3890_v39 = vld [vmem:[%s5435_s1 + $0x4c8] ss:$16 sps:$4 sm:$0xff]  }
  0x65   : > { %1608 = vmatpush1.bf16.msra.mxu0 %v3815_v43  ;;  %v3904_v43 = vld [vmem:[%s5435_s1 + $0x48c] ss:$16 sps:$4 sm:$0xff]  }
  0x66   : > { %1690 = vmatpush1.bf16.msra.mxu1 %v3812_v40  ;;  %1609 = vmatprep.subr.bf16.mxu0 %v3823_v46  ;;  %v3898_v40 = vld [vmem:[%s5435_s1 + $0x4ac] ss:$16 sps:$4 sm:$0xff]   ;;  %v3902_v46 = vld [vmem:[%s5435_s1 + $0x488] ss:$16 sps:$4 sm:$0xff]  }
  0x67   : > { %1691 = vmatprep.subr.bf16.mxu1 %v3820_v45  ;;  %v3907_v45 = vld [vmem:[%s5435_s1 + $0x24c] ss:$16 sps:$4 sm:$0xff]  }
  0x69   : > { %1610 = vmatpush1.bf16.msra.mxu0 %v3821_v48  ;;  %v3913_v48 = vld [vmem:[%s5435_s1 + $0x22c] ss:$16 sps:$4 sm:$0xff]  }
  0x6a   : > { %1692 = vmatpush1.bf16.msra.mxu1 %v3818_v47  ;;  %1611 = vmatprep.subr.bf16.mxu0 %v3829_v50  ;;  %v3910_v47 = vld [vmem:[%s5435_s1 + $0x46c] ss:$16 sps:$4 sm:$0xff]   ;;  %v3911_v50 = vld [vmem:[%s5435_s1 + $0x228] ss:$16 sps:$4 sm:$0xff]  }
  0x6b   : > { %1693 = vmatprep.subr.bf16.mxu1 %v3826_v49  ;;  %v3908_v49 = vld [vmem:[%s5435_s1 + $0x468] ss:$16 sps:$4 sm:$0xff]  }
  0x6d   : > { %1612 = vmatpush2.bf16.msra.mxu0 %v3827_v52  ;;  %v3919_v52 = vld [vmem:[%s5435_s1 + $0x20c] ss:$16 sps:$4 sm:$0xff]  }
  0x6e   : > { %1694 = vmatpush1.bf16.msra.mxu1 %v3824_v51  ;;  %1613 = vmatprep.subr.bf16.mxu0 %v3835_v55  ;;  %v3916_v51 = vld [vmem:[%s5435_s1 + $0x44c] ss:$16 sps:$4 sm:$0xff]   ;;  %v3917_v55 = vld [vmem:[%s5435_s1 + $0x208] ss:$16 sps:$4 sm:$0xff]  }
  0x6f   : > { %1695 = vmatprep.subr.bf16.mxu1 %v3832_v53  ;;  %v3914_v53 = vld [vmem:[%s5435_s1 + $0x448] ss:$16 sps:$4 sm:$0xff]  }
  0x71   : > { %1614 = vmatpush2.bf16.msra.mxu0 %v3833_v57  ;;  %v3925_v57 = vld [vmem:[%s5435_s1 + $0x3ec] ss:$16 sps:$4 sm:$0xff]  }
  0x72   : > { %1696 = vmatpush1.bf16.msra.mxu1 %v3830_v56  ;;  %1615 = vmatprep.subr.bf16.mxu0 %v3841_v59  ;;  %v3922_v56 = vld [vmem:[%s5435_s1 + $0x42c] ss:$16 sps:$4 sm:$0xff]   ;;  %v3923_v59 = vld [vmem:[%s5435_s1 + $0x3e8] ss:$16 sps:$4 sm:$0xff]  }
  0x73   : > { %1697 = vmatprep.subr.bf16.mxu1 %v3838_v58  ;;  %v3920_v58 = vld [vmem:[%s5435_s1 + $0x428] ss:$16 sps:$4 sm:$0xff]  }
  0x75   : > { %1616 = vmatpush2.bf16.msra.mxu0 %v3839_v61  ;;  %v3931_v61 = vld [vmem:[%s5435_s1 + $0x3cc] ss:$16 sps:$4 sm:$0xff]  }
  0x76   : > { %1698 = vmatpush2.bf16.msra.mxu1 %v3836_v60  ;;  %1617 = vmatprep.subr.bf16.mxu0 %v3847_v63  ;;  %v3928_v60 = vld [vmem:[%s5435_s1 + $0x40c] ss:$16 sps:$4 sm:$0xff]   ;;  %v3929_v63 = vld [vmem:[%s5435_s1 + $0x3c8] ss:$16 sps:$4 sm:$0xff]  }
  0x77   : > { %1699 = vmatprep.subr.bf16.mxu1 %v3844_v62  ;;  %v3926_v62 = vld [vmem:[%s5435_s1 + $0x408] ss:$16 sps:$4 sm:$0xff]  }
  0x79   : > { %1618 = vmatpush2.bf16.msra.mxu0 %v3845_v1  ;;  %v3937_v1 = vld [vmem:[%s5435_s1 + $0x3ac] ss:$16 sps:$4 sm:$0xff]  }
  0x7a   : > { %1700 = vmatpush2.bf16.msra.mxu1 %v3842_v0  ;;  %1619 = vmatprep.subr.bf16.mxu0 %v3853_v3  ;;  %v3934_v0 = vld [vmem:[%s5435_s1 + $0x5ec] ss:$16 sps:$4 sm:$0xff]   ;;  %v3935_v3 = vld [vmem:[%s5435_s1 + $0x3a8] ss:$16 sps:$4 sm:$0xff]  }
  0x7b   : > { %1701 = vmatprep.subr.bf16.mxu1 %v3850_v2  ;;  %v3932_v2 = vld [vmem:[%s5435_s1 + $0x5e8] ss:$16 sps:$4 sm:$0xff]  }
  0x7d   : > { %1620 = vmatpush2.bf16.msra.mxu0 %v3851_v5  ;;  %v3943_v5 = vld [vmem:[%s5435_s1 + $0x38c] ss:$16 sps:$4 sm:$0xff]  }
  0x7e   : > { %1702 = vmatpush2.bf16.msra.mxu1 %v3848_v4  ;;  %1621 = vmatprep.subr.bf16.mxu0 %v3859_v7  ;;  %v3940_v4 = vld [vmem:[%s5435_s1 + $0x5cc] ss:$16 sps:$4 sm:$0xff]   ;;  %v3941_v7 = vld [vmem:[%s5435_s1 + $0x388] ss:$16 sps:$4 sm:$0xff]  }
  0x7f   : > { %1703 = vmatprep.subr.bf16.mxu1 %v3856_v6  ;;  %v3938_v6 = vld [vmem:[%s5435_s1 + $0x5c8] ss:$16 sps:$4 sm:$0xff]  }
  0x81   : > { %1622 = vmatpush2.bf16.msra.mxu0 %v3857_v9  ;;  %v3949_v9 = vld [vmem:[%s5435_s1 + $0x36c] ss:$16 sps:$4 sm:$0xff]  }
  0x82   : > { %1704 = vmatpush2.bf16.msra.mxu1 %v3854_v8  ;;  %1623 = vmatprep.subr.bf16.mxu0 %v3865_v11  ;;  %v3946_v8 = vld [vmem:[%s5435_s1 + $0x5ac] ss:$16 sps:$4 sm:$0xff]   ;;  %v3947_v11 = vld [vmem:[%s5435_s1 + $0x368] ss:$16 sps:$4 sm:$0xff]  }
  0x83   : > { %1705 = vmatprep.subr.bf16.mxu1 %v3862_v10  ;;  %v3944_v10 = vld [vmem:[%s5435_s1 + $0x5a8] ss:$16 sps:$4 sm:$0xff]  }
  0x85   : > { %1624 = vmatpush2.bf16.msra.mxu0 %v3863_v15  ;;  %v3955_v15 = vld [vmem:[%s5435_s1 + $0x34c] ss:$16 sps:$4 sm:$0xff]  }
  0x86   : > { %1706 = vmatpush2.bf16.msra.mxu1 %v3860_v14  ;;  %1625 = vmatprep.subr.bf16.mxu0 %v3871_v17  ;;  %v3952_v14 = vld [vmem:[%s5435_s1 + $0x58c] ss:$16 sps:$4 sm:$0xff]   ;;  %v3953_v17 = vld [vmem:[%s5435_s1 + $0x348] ss:$16 sps:$4 sm:$0xff]  }
  0x87   : > { %1707 = vmatprep.subr.bf16.mxu1 %v3868_v16  ;;  %v3950_v16 = vld [vmem:[%s5435_s1 + $0x588] ss:$16 sps:$4 sm:$0xff]  }
  0x89   : > { %1626 = vmatpush2.bf16.msra.mxu0 %v3869_v19  ;;  %v3961_v19 = vld [vmem:[%s5435_s1 + $0x32c] ss:$16 sps:$4 sm:$0xff]  }
  0x8a   : > { %1708 = vmatpush2.bf16.msra.mxu1 %v3866_v18  ;;  %1724 = vmatprep.subr.bf16.mxu0 %v3877_v25  ;;  %v3958_v18 = vld [vmem:[%s5435_s1 + $0x56c] ss:$16 sps:$4 sm:$0xff]  }
  0x8b   : > { %1709 = vmatprep.subr.bf16.mxu1 %v3874_v24  ;;  %v3964_v24 = vld [vmem:[%s5435_s1 + $0x54c] ss:$16 sps:$4 sm:$0xff]  }
  0x8c   : > { %1628 = vmatmul.mubr.bf16.vlgmr.msra.gmra.mxu0 %v4687_v26  ;;  %v3967_v25 = vld [vmem:[%s5435_s1 + $0x30c] ss:$16 sps:$4 sm:$0xff]  }
  0x8d   : > { %1725 = vmatpush1.bf16.msra.mxu0 %v3875_v28  ;;  %1756 = vmatprep.mubr.bf16.mxu0 %v4421_v54  ;;  %v3893_v54 = vld [vmem:[%s5435_s1 + $0x288] ss:$16 sps:$4 sm:$0xff]  }
  0x8e   : > { %1710 = vmatpush2.bf16.msra.mxu1 %v3872_v27  ;;  %1726 = vmatprep.subr.bf16.mxu0 %v3883_v30  ;;  %v3962_v27 = vld [vmem:[%s5435_s1 + $0x548] ss:$16 sps:$4 sm:$0xff]   ;;  %v3973_v30 = vld [vmem:[%s5435_s1 + $0x60c] ss:$16 sps:$4 sm:$0xff]  }
  0x8f   : > { %1711 = vmatprep.subr.bf16.mxu1 %v3880_v29  ;;  %v3965_v28 = vld [vmem:[%s5435_s1 + $0x308] ss:$16 sps:$4 sm:$0xff]   ;;  %v3970_v29 = vld [vmem:[%s5435_s1 + $0x52c] ss:$16 sps:$4 sm:$0xff]  }
  0x91   : > { %1727 = vmatpush1.bf16.msra.mxu0 %v3881_v32  ;;  %v3971_v32 = vld [vmem:[%s5435_s1 + $0x608] ss:$16 sps:$4 sm:$0xff]  }
  0x92   : > { %1712 = vmatpush2.bf16.msra.mxu1 %v3878_v31  ;;  %1728 = vmatprep.subr.bf16.mxu0 %v3889_v34  ;;  %v3968_v31 = vld [vmem:[%s5435_s1 + $0x528] ss:$16 sps:$4 sm:$0xff]   ;;  %v3979_v34 = vld [vmem:[%s5437_s3 + $0xe4] ss:$16 sps:$4 sm:$0xff]  }
  0x93   : > { %1767 = vmatprep.subr.bf16.mxu1 %v3886_v33  ;;  %v3976_v33 = vld [vmem:[%s5435_s1 + $0x50c] ss:$16 sps:$4 sm:$0xff]  }
  0x95   : > { %1714 = vmatmul.mubr.bf16.vlgmr.msra.gmra.mxu1 %v4480_v12  ;;  %1729 = vmatpush1.bf16.msra.mxu0 %v3887_v36  ;;  %v3899_v12 = vld [vmem:[%s5435_s1 + $0x268] ss:$16 sps:$4 sm:$0xff]   ;;  %v3977_v36 = vld [vmem:[%s5437_s3 + $0xe0] ss:$16 sps:$4 sm:$0xff]  }
  0x96   : > { %1768 = vmatpush1.bf16.msra.mxu1 %v3884_v35  ;;  %1730 = vmatprep.subr.bf16.mxu0 %v3895_v38  ;;  %v3974_v35 = vld [vmem:[%s5435_s1 + $0x508] ss:$16 sps:$4 sm:$0xff]   ;;  %v3980_v38 = vld [vmem:[%s5437_s3 + $0xc0] ss:$16 sps:$4 sm:$0xff]  }
  0x97   : > { %1769 = vmatprep.subr.bf16.mxu1 %v3892_v37  ;;  %1799 = vmatprep.mubr.bf16.mxu1 %v4568_v44  ;;  %v3905_v44 = vld [vmem:[%s5435_s1 + $0x248] ss:$16 sps:$4 sm:$0xff]   ;;  %v3982_v37 = vld [vmem:[%s5437_s3 + $0xc4] ss:$16 sps:$4 sm:$0xff]  }
  0x99   : > { %1731 = vmatpush1.bf16.msra.mxu0 %v3893_v54  ;;  %v3989_v54 = vld [vmem:[%s5437_s3 + $0x60] ss:$16 sps:$4 sm:$0xff]  }
  0x9a   : > { %1770 = vmatpush1.bf16.msra.mxu1 %v3890_v39  ;;  %1732 = vmatprep.subr.bf16.mxu0 %v3901_v41  ;;  %v3988_v39 = vld [vmem:[%s5437_s3 + $0x84] ss:$16 sps:$4 sm:$0xff]  }
  0x9b   : > { %1771 = vmatprep.subr.bf16.mxu1 %v3898_v40  ;;  %v4031_v40 = vld [vmem:[%s5437_s3 + $0x2e0] ss:$16 sps:$4 sm:$0xff]   ;;  %v4033_v41 = vld [vmem:[%s5437_s3 + $0x2e4] ss:$16 sps:$4 sm:$0xff]  }
  0x9d   : > { %1733 = vmatpush1.bf16.msra.mxu0 %v3899_v12  ;;  %v3992_v12 = vld [vmem:[%s5437_s3 + $0x40] ss:$16 sps:$4 sm:$0xff]  }
  0x9e   : > { %1772 = vmatpush1.bf16.msra.mxu1 %v3896_v42  ;;  %1734 = vmatprep.subr.bf16.mxu0 %v3907_v45  ;;  %v3994_v42 = vld [vmem:[%s5437_s3 + $0x44] ss:$16 sps:$4 sm:$0xff]  }
  0x9f   : > { %1773 = vmatprep.subr.bf16.mxu1 %v3904_v43  ;;  %v4037_v43 = vld [vmem:[%s5437_s3 + $0x2c0] ss:$16 sps:$4 sm:$0xff]   ;;  %v4039_v45 = vld [vmem:[%s5437_s3 + $0x2c4] ss:$16 sps:$4 sm:$0xff]  }
  0xa1   : > { %1735 = vmatpush1.bf16.msra.mxu0 %v3905_v44  ;;  %v3995_v44 = vld [vmem:[%s5437_s3 + $0x20] ss:$16 sps:$4 sm:$0xff]  }
  0xa2   : > { %1774 = vmatpush1.bf16.msra.mxu1 %v3902_v46  ;;  %1736 = vmatprep.subr.bf16.mxu0 %v3913_v48  ;;  %v3997_v46 = vld [vmem:[%s5437_s3 + $0x24] ss:$16 sps:$4 sm:$0xff]  }
  0xa3   : > { %1775 = vmatprep.subr.bf16.mxu1 %v3910_v47  ;;  %v4043_v47 = vld [vmem:[%s5437_s3 + $0x2a0] ss:$16 sps:$4 sm:$0xff]   ;;  %v4045_v48 = vld [vmem:[%s5437_s3 + $0x2a4] ss:$16 sps:$4 sm:$0xff]  }
  0xa5   : > { %1737 = vmatpush1.bf16.msra.mxu0 %v3911_v50  ;;  %v3998_v50 = vld [vmem:[%s5437_s3] ss:$16 sps:$4 sm:$0xff]  }
  0xa6   : > { %1776 = vmatpush1.bf16.msra.mxu1 %v3908_v49  ;;  %1738 = vmatprep.subr.bf16.mxu0 %v3919_v52  ;;  %v4000_v49 = vld [vmem:[%s5437_s3 + $0x4] ss:$16 sps:$4 sm:$0xff]  }
  0xa7   : > { %1777 = vmatprep.subr.bf16.mxu1 %v3916_v51  ;;  %v4049_v51 = vld [vmem:[%s5437_s3 + $0x280] ss:$16 sps:$4 sm:$0xff]   ;;  %v4051_v52 = vld [vmem:[%s5437_s3 + $0x284] ss:$16 sps:$4 sm:$0xff]  }
  0xa9   : > { %1739 = vmatpush1.bf16.msra.mxu0 %v3917_v55  ;;  %v4001_v55 = vld [vmem:[%s5437_s3 + $0x1e0] ss:$16 sps:$4 sm:$0xff]  }
  0xaa   : > { %1778 = vmatpush1.bf16.msra.mxu1 %v3914_v53  ;;  %1740 = vmatprep.subr.bf16.mxu0 %v3925_v57  ;;  %v4003_v53 = vld [vmem:[%s5437_s3 + $0x1e4] ss:$16 sps:$4 sm:$0xff]  }
  0xab   : > { %1779 = vmatprep.subr.bf16.mxu1 %v3922_v56  ;;  %v4055_v56 = vld [vmem:[%s5437_s3 + $0x260] ss:$16 sps:$4 sm:$0xff]   ;;  %v4057_v57 = vld [vmem:[%s5437_s3 + $0x264] ss:$16 sps:$4 sm:$0xff]  }
  0xad   : > { %1741 = vmatpush2.bf16.msra.mxu0 %v3923_v59  ;;  %v4004_v59 = vld [vmem:[%s5437_s3 + $0x1c0] ss:$16 sps:$4 sm:$0xff]  }
  0xae   : > { %1780 = vmatpush1.bf16.msra.mxu1 %v3920_v58  ;;  %1742 = vmatprep.subr.bf16.mxu0 %v3931_v61  ;;  %v4006_v58 = vld [vmem:[%s5437_s3 + $0x1c4] ss:$16 sps:$4 sm:$0xff]  }
  0xaf   : > { %1781 = vmatprep.subr.bf16.mxu1 %v3928_v60  ;;  %v4061_v60 = vld [vmem:[%s5437_s3 + $0x240] ss:$16 sps:$4 sm:$0xff]   ;;  %v4063_v61 = vld [vmem:[%s5437_s3 + $0x244] ss:$16 sps:$4 sm:$0xff]  }
  0xb1   : > { %1743 = vmatpush2.bf16.msra.mxu0 %v3929_v63  ;;  %v4007_v63 = vld [vmem:[%s5437_s3 + $0x1a0] ss:$16 sps:$4 sm:$0xff]  }
  0xb2   : > { %1782 = vmatpush1.bf16.msra.mxu1 %v3926_v62  ;;  %1744 = vmatprep.subr.bf16.mxu0 %v3937_v1  ;;  %v4009_v62 = vld [vmem:[%s5437_s3 + $0x1a4] ss:$16 sps:$4 sm:$0xff]  }
  0xb3   : > { %1783 = vmatprep.subr.bf16.mxu1 %v3934_v0  ;;  %v4067_v0 = vld [vmem:[%s5437_s3 + $0x220] ss:$16 sps:$4 sm:$0xff]   ;;  %v4069_v1 = vld [vmem:[%s5437_s3 + $0x224] ss:$16 sps:$4 sm:$0xff]  }
  0xb5   : > { %1745 = vmatpush2.bf16.msra.mxu0 %v3935_v3  ;;  %v4010_v3 = vld [vmem:[%s5437_s3 + $0x180] ss:$16 sps:$4 sm:$0xff]  }
  0xb6   : > { %1784 = vmatpush2.bf16.msra.mxu1 %v3932_v2  ;;  %1746 = vmatprep.subr.bf16.mxu0 %v3943_v5  ;;  %v4012_v2 = vld [vmem:[%s5437_s3 + $0x184] ss:$16 sps:$4 sm:$0xff]  }
  0xb7   : > { %1785 = vmatprep.subr.bf16.mxu1 %v3940_v4  ;;  %v4073_v4 = vld [vmem:[%s5437_s3 + $0x200] ss:$16 sps:$4 sm:$0xff]   ;;  %v4075_v5 = vld [vmem:[%s5437_s3 + $0x204] ss:$16 sps:$4 sm:$0xff]  }
  0xb9   : > { %1747 = vmatpush2.bf16.msra.mxu0 %v3941_v7  ;;  %v4013_v7 = vld [vmem:[%s5437_s3 + $0x160] ss:$16 sps:$4 sm:$0xff]  }
  0xba   : > { %1786 = vmatpush2.bf16.msra.mxu1 %v3938_v6  ;;  %1748 = vmatprep.subr.bf16.mxu0 %v3949_v9  ;;  %v4015_v6 = vld [vmem:[%s5437_s3 + $0x164] ss:$16 sps:$4 sm:$0xff]  }
  0xbb   : > { %1787 = vmatprep.subr.bf16.mxu1 %v3946_v8  ;;  %v4079_v8 = vld [vmem:[%s5437_s3 + $0x3e0] ss:$16 sps:$4 sm:$0xff]   ;;  %v4081_v9 = vld [vmem:[%s5437_s3 + $0x3e4] ss:$16 sps:$4 sm:$0xff]  }
  0xbd   : > { %1749 = vmatpush2.bf16.msra.mxu0 %v3947_v11  ;;  %v4016_v11 = vld [vmem:[%s5437_s3 + $0x140] ss:$16 sps:$4 sm:$0xff]  }
  0xbe   : > { %1788 = vmatpush2.bf16.msra.mxu1 %v3944_v10  ;;  %1750 = vmatprep.subr.bf16.mxu0 %v3955_v15  ;;  %v4018_v10 = vld [vmem:[%s5437_s3 + $0x144] ss:$16 sps:$4 sm:$0xff]  }
  0xbf   : > { %1789 = vmatprep.subr.bf16.mxu1 %v3952_v14  ;;  %v4085_v14 = vld [vmem:[%s5437_s3 + $0x3c0] ss:$16 sps:$4 sm:$0xff]   ;;  %v4087_v15 = vld [vmem:[%s5437_s3 + $0x3c4] ss:$16 sps:$4 sm:$0xff]  }
  0xc1   : > { %1751 = vmatpush2.bf16.msra.mxu0 %v3953_v17  ;;  %v4019_v17 = vld [vmem:[%s5437_s3 + $0x120] ss:$16 sps:$4 sm:$0xff]  }
  0xc2   : > { %1790 = vmatpush2.bf16.msra.mxu1 %v3950_v16  ;;  %1752 = vmatprep.subr.bf16.mxu0 %v3961_v19  ;;  %v4021_v16 = vld [vmem:[%s5437_s3 + $0x124] ss:$16 sps:$4 sm:$0xff]  }
  0xc3   : > { %1791 = vmatprep.subr.bf16.mxu1 %v3958_v18  ;;  %v4091_v18 = vld [vmem:[%s5437_s3 + $0x3a0] ss:$16 sps:$4 sm:$0xff]   ;;  %v4093_v19 = vld [vmem:[%s5437_s3 + $0x3a4] ss:$16 sps:$4 sm:$0xff]  }
  0xc5   : > { %1753 = vmatpush2.bf16.msra.mxu0 %v3959_v22  ;;  %v4022_v22 = vld [vmem:[%s5437_s3 + $0x100] ss:$16 sps:$4 sm:$0xff]  }
  0xc6   : > { %1792 = vmatpush2.bf16.msra.mxu1 %v3956_v20  ;;  %1754 = vmatprep.subr.bf16.mxu0 %v3967_v25  ;;  %v4024_v20 = vld [vmem:[%s5437_s3 + $0x104] ss:$16 sps:$4 sm:$0xff]   ;;  %v4027_v25 = vld [vmem:[%s5437_s3 + $0xec] ss:$16 sps:$4 sm:$0xff]  }
  0xc7   : > { %1793 = vmatprep.subr.bf16.mxu1 %v3964_v24  ;;  %v4099_v24 = vld [vmem:[%s5437_s3 + $0x384] ss:$16 sps:$4 sm:$0xff]  }
  0xc9   : > { %1755 = vmatpush2.bf16.msra.mxu0 %v3965_v28  ;;  %v4105_v28 = vld [vmem:[%s5437_s3 + $0x364] ss:$16 sps:$4 sm:$0xff]  }
  0xca   : > { %1794 = vmatpush2.bf16.msra.mxu1 %v3962_v27  ;;  %1824 = vmatprep.subr.bf16.mxu0 %v3973_v30  ;;  %v4097_v27 = vld [vmem:[%s5437_s3 + $0x380] ss:$16 sps:$4 sm:$0xff]   ;;  %v4111_v30 = vld [vmem:[%s5437_s3 + $0x344] ss:$16 sps:$4 sm:$0xff]  }
  0xcb   : > { %1795 = vmatprep.subr.bf16.mxu1 %v3970_v29  ;;  %v4103_v29 = vld [vmem:[%s5437_s3 + $0x360] ss:$16 sps:$4 sm:$0xff]  }
  0xcc   : > { %1757 = vmatmul.mubr.bf16.vlgmr.msra.gmra.mxu0 %v4482_v13  ;;  %v3985_v13 = vld [vmem:[%s5437_s3 + $0xa4] ss:$16 sps:$4 sm:$0xff]  }
  0xcd   : > { %1825 = vmatpush1.bf16.msra.mxu0 %v3971_v32  ;;  %1842 = vmatprep.mubr.bf16.mxu0 %v4209_v21  ;;  %v3983_v21 = vld [vmem:[%s5437_s3 + $0xa0] ss:$16 sps:$4 sm:$0xff]   ;;  %v4117_v32 = vld [vmem:[%s5437_s3 + $0x324] ss:$16 sps:$4 sm:$0xff]  }
  0xce   : > { %1796 = vmatpush2.bf16.msra.mxu1 %v3968_v31  ;;  %2655 = vmatprep.subr.bf16.mxu0 %v3979_v34  ;;  %v4109_v31 = vld [vmem:[%s5437_s3 + $0x340] ss:$16 sps:$4 sm:$0xff]   ;;  %v4120_v34 = vld [vmem:[%s5437_s3 + $0x304] ss:$16 sps:$4 sm:$0xff]  }
  0xcf   : > { %1797 = vmatprep.subr.bf16.mxu1 %v3976_v33  ;;  %v4115_v33 = vld [vmem:[%s5437_s3 + $0x320] ss:$16 sps:$4 sm:$0xff]  }
  0xd2   : > { %1798 = vmatpush2.bf16.msra.mxu1 %v3974_v35  ;;  %v4118_v35 = vld [vmem:[%s5437_s3 + $0x300] ss:$16 sps:$4 sm:$0xff]  }
  0xd3   : > { %2698 = vmatprep.subr.bf16.mxu1 %v4033_v41  ;;  %v5107_v41 = vld [vmem:[%s5436_s2] sm:$0xf] }
  0xd4   : > { %3456 = vmatmul.mubr.msk.bf16.vlgmr.msra.gmra.mxu0 %vm1505_vm0, %v4507_v23  ;;  %v3986_v23 = vld [vmem:[%s5437_s3 + $0x80] ss:$16 sps:$4 sm:$0xff]  }
  0xd5   : > { %1800 = vmatmul.mubr.bf16.vlgmr.msra.gmra.mxu1 %v4687_v26  ;;  %2656 = vmatpush1.bf16.msra.mxu0 %v3977_v36  ;;  %v3991_v26 = vld [vmem:[%s5437_s3 + $0x64] ss:$16 sps:$4 sm:$0xff]   ;;  %v4123_v36 = vld [vmem:[%s5437_s3 + $0x2ec] ss:$16 sps:$4 sm:$0xff]  }
  0xd6   : > { %2657 = vmatprep.subr.bf16.mxu0 %v3982_v37  ;;  %2699 = vmatpush1.bf16.msra.mxu1 %v4031_v40 }
  0xd7   : > { %2700 = vmatprep.subr.bf16.mxu1 %v4039_v45 }
  0xd9   : > { %2658 = vmatpush1.bf16.msra.mxu0 %v3980_v38  ;;  %v505_v38 = vlaneseq }
  0xda   : > { %2659 = vmatprep.subr.bf16.mxu0 %v3985_v13  ;;  %2701 = vmatpush1.bf16.msra.mxu1 %v4037_v43 }
  0xdb   : > { %2702 = vmatprep.subr.bf16.mxu1 %v4045_v48 }
  0xdd   : > { %2660 = vmatpush1.bf16.msra.mxu0 %v3983_v21  ;;  %v5100_v21 = vshrl.u32 %v505_v38, 7  ;;  %v4082_v38 = vld [vmem:[%s5437_s3 + $0x1a8] ss:$16 sps:$4 sm:$0xff]  }
  0xde   : > { %2661 = vmatprep.subr.bf16.mxu0 %v3988_v39  ;;  %2703 = vmatpush1.bf16.msra.mxu1 %v4043_v47 }
  0xdf   : > { %2704 = vmatprep.subr.bf16.mxu1 %v4051_v52 }
  0xe1   : > { %2662 = vmatpush1.bf16.msra.mxu0 %v3986_v23 }
  0xe2   : > { %2663 = vmatprep.subr.bf16.mxu0 %v3991_v26  ;;  %2705 = vmatpush1.bf16.msra.mxu1 %v4049_v51  ;;  %v511_v26 = vsub.s32 1, %v5100_v21 }
  0xe3   : > { %2706 = vmatprep.subr.bf16.mxu1 %v4057_v57 }
  0xe5   : > { %2664 = vmatpush1.bf16.msra.mxu0 %v3989_v54  ;;  %v507_v54 = vsub.s32 0, %v5100_v21 }
  0xe6   : > { %2665 = vmatprep.subr.bf16.mxu0 %v3994_v42  ;;  %2707 = vmatpush1.bf16.msra.mxu1 %v4055_v56 }
  0xe7   : > { %2708 = vmatprep.subr.bf16.mxu1 %v4063_v61  ;;  %v508_v43 = vrot.slane %v5107_v41, %v507_v54 }
  0xe9   : > { %2666 = vmatpush1.bf16.msra.mxu0 %v3992_v12  ;;  %v512_v12 = vrot.slane %v5107_v41, %v511_v26 }
  0xea   : > { %2667 = vmatprep.subr.bf16.mxu0 %v3997_v46  ;;  %2709 = vmatpush1.bf16.msra.mxu1 %v4061_v60 }
  0xeb   : > { %2710 = vmatprep.subr.bf16.mxu1 %v4069_v1 }
  0xed   : > { %2668 = vmatpush1.bf16.msra.mxu0 %v3995_v44 }
  0xee   : > { %2669 = vmatprep.subr.bf16.mxu0 %v4000_v49  ;;  %2711 = vmatpush1.bf16.msra.mxu1 %v4067_v0 }
  0xef   : > { %2712 = vmatprep.subr.bf16.mxu1 %v4075_v5 }
  0xf1   : > { %2670 = vmatpush1.bf16.msra.mxu0 %v3998_v50 }
  0xf2   : > { %2671 = vmatprep.subr.bf16.mxu0 %v4003_v53  ;;  %2713 = vmatpush1.bf16.msra.mxu1 %v4073_v4 }
  0xf3   : > { %2714 = vmatprep.subr.bf16.mxu1 %v4081_v9 }
  0xf5   : > { %2672 = vmatpush2.bf16.msra.mxu0 %v4001_v55 }
  0xf6   : > { %2673 = vmatprep.subr.bf16.mxu0 %v4006_v58  ;;  %2715 = vmatpush2.bf16.msra.mxu1 %v4079_v8 }
  0xf7   : > { %2716 = vmatprep.subr.bf16.mxu1 %v4087_v15 }
  0xf9   : > { %2674 = vmatpush2.bf16.msra.mxu0 %v4004_v59 }
  0xfa   : > { %2675 = vmatprep.subr.bf16.mxu0 %v4009_v62  ;;  %2717 = vmatpush2.bf16.msra.mxu1 %v4085_v14  ;;  %v4025_v14 = vld [vmem:[%s5437_s3 + $0xe8] ss:$16 sps:$4 sm:$0xff]  }
  0xfb   : > { %2718 = vmatprep.subr.bf16.mxu1 %v4093_v19  ;;  %v4034_v19 = vld [vmem:[%s5437_s3 + $0xa8] ss:$16 sps:$4 sm:$0xff]  }
  0xfd   : > { %2676 = vmatpush2.bf16.msra.mxu0 %v4007_v63 }
  0xfe   : > { %2677 = vmatprep.subr.bf16.mxu0 %v4012_v2  ;;  %2719 = vmatpush2.bf16.msra.mxu1 %v4091_v18  ;;  %v4036_v18 = vld [vmem:[%s5437_s3 + $0xac] ss:$16 sps:$4 sm:$0xff]  }
  0xff   : > { %2720 = vmatprep.subr.bf16.mxu1 %v4099_v24  ;;  %v4048_v24 = vld [vmem:[%s5437_s3 + $0x6c] ss:$16 sps:$4 sm:$0xff]  }
 0x101   : > { %2678 = vmatpush2.bf16.msra.mxu0 %v4010_v3 }
 0x102   : > { %2679 = vmatprep.subr.bf16.mxu0 %v4015_v6  ;;  %2721 = vmatpush2.bf16.msra.mxu1 %v4097_v27  ;;  %v4054_v27 = vld [vmem:[%s5437_s3 + $0x4c] ss:$16 sps:$4 sm:$0xff]  }
 0x103   : > { %2722 = vmatprep.subr.bf16.mxu1 %v4105_v28  ;;  %v4052_v28 = vld [vmem:[%s5437_s3 + $0x48] ss:$16 sps:$4 sm:$0xff]  }
 0x105   : > { %2680 = vmatpush2.bf16.msra.mxu0 %v4013_v7 }
 0x106   : > { %2681 = vmatprep.subr.bf16.mxu0 %v4018_v10  ;;  %2723 = vmatpush2.bf16.msra.mxu1 %v4103_v29  ;;  %v4060_v29 = vld [vmem:[%s5437_s3 + $0x2c] ss:$16 sps:$4 sm:$0xff]  }
 0x107   : > { %2724 = vmatprep.subr.bf16.mxu1 %v4111_v30  ;;  %v4058_v30 = vld [vmem:[%s5437_s3 + $0x28] ss:$16 sps:$4 sm:$0xff]  }
 0x109   : > { %2682 = vmatpush2.bf16.msra.mxu0 %v4016_v11 }
 0x10a   : > { %2683 = vmatprep.subr.bf16.mxu0 %v4021_v16  ;;  %2725 = vmatpush2.bf16.msra.mxu1 %v4109_v31  ;;  %v4030_v16 = vld [vmem:[%s5437_s3 + $0xcc] ss:$16 sps:$4 sm:$0xff]  }
 0x10b   : > { %2726 = vmatprep.subr.bf16.mxu1 %v4117_v32  ;;  %v4066_v31 = vld [vmem:[%s5437_s3 + $0xc] ss:$16 sps:$4 sm:$0xff]   ;;  %v4064_v32 = vld [vmem:[%s5437_s3 + $0x8] ss:$16 sps:$4 sm:$0xff]  }
 0x10c   : > { %v1543_v39 = vpop.f32.mrf.mxu0 }
 0x10d   : > { %2684 = vmatpush2.bf16.msra.mxu0 %v4019_v17  ;;  %v1586_v37 = vpop.f32.mrf.mxu1  ;;  %v1544_v47 = vadd.f32 %v1543_v39, %v508_v43  ;;  %v4028_v17 = vld [vmem:[%s5437_s3 + $0xc8] ss:$16 sps:$4 sm:$0xff]  }
 0x10e   : > { %2685 = vmatprep.subr.bf16.mxu0 %v4024_v20  ;;  %2727 = vmatpush2.bf16.msra.mxu1 %v4115_v33  ;;  %v1545_v40 = vpop.f32.mrf.mxu0  ;;  %v4042_v20 = vld [vmem:[%s5437_s3 + $0x8c] ss:$16 sps:$4 sm:$0xff]   ;;  %v4088_v39 = vld [vmem:[%s5437_s3 + $0x188] ss:$16 sps:$4 sm:$0xff]  }
 0x10f   : > { %2728 = vmatprep.subr.bf16.mxu1 %v4120_v34  ;;  %v1588_v13 = vpop.f32.mrf.mxu1  ;;  %v1546_v44 = vadd.f32 %v1545_v40, %v512_v12  ;;  %v1587_v55 = vadd.f32 %v1586_v37, %v1544_v47  ;;  %v4072_v33 = vld [vmem:[%s5437_s3 + $0x1ec] ss:$16 sps:$4 sm:$0xff]   ;;  %v4070_v34 = vld [vmem:[%s5437_s3 + $0x1e8] ss:$16 sps:$4 sm:$0xff]  }
 0x110   : > { %v1547_v45 = vpop.f32.mrf.mxu0  ;;  %v4084_v37 = vld [vmem:[%s5437_s3 + $0x1ac] ss:$16 sps:$4 sm:$0xff]   ;;  %v4100_v47 = vld [vmem:[%s5437_s3 + $0x148] ss:$16 sps:$4 sm:$0xff]  }
 0x111   : > { %2686 = vmatpush2.bf16.msra.mxu0 %v4022_v22  ;;  %v1590_v23 = vpop.f32.mrf.mxu1  ;;  %v1548_v49 = vadd.f32 %v1547_v45, %v508_v43  ;;  %v1589_v52 = vadd.f32 %v1588_v13, %v1546_v44  ;;  %v4040_v22 = vld [vmem:[%s5437_s3 + $0x88] ss:$16 sps:$4 sm:$0xff]   ;;  %v4090_v13 = vld [vmem:[%s5437_s3 + $0x18c] ss:$16 sps:$4 sm:$0xff]   ;;  %v519_v45 = vsub.s32 3, %v5100_v21 }
 0x112   : > { %2741 = vmatprep.subr.bf16.mxu0 %v4027_v25  ;;  %2729 = vmatpush2.bf16.msra.mxu1 %v4118_v35  ;;  %v1549_v48 = vpop.f32.mrf.mxu0  ;;  %v4046_v25 = vld [vmem:[%s5437_s3 + $0x68] ss:$16 sps:$4 sm:$0xff]   ;;  %v4078_v35 = vld [vmem:[%s5437_s3 + $0x1cc] ss:$16 sps:$4 sm:$0xff]  }
 0x113   : > { %2784 = vmatprep.subr.bf16.mxu1 %v4123_v36  ;;  %v1592_v42 = vpop.f32.mrf.mxu1  ;;  %v1550_v53 = vadd.f32 %v1549_v48, %v512_v12  ;;  %v1591_v57 = vadd.f32 %v1590_v23, %v1548_v49  ;;  %v4076_v36 = vld [vmem:[%s5437_s3 + $0x1c8] ss:$16 sps:$4 sm:$0xff]   ;;  %v4096_v40 = vld [vmem:[%s5437_s3 + $0x16c] ss:$16 sps:$4 sm:$0xff]  }
 0x114   : > { %v4102_v43 = vld [vmem:[%s5437_s3 + $0x14c] ss:$16 sps:$4 sm:$0xff]  }
 0x115   : > { %v1672_v46 = vpop.f32.mrf.mxu1  ;;  %v1593_v62 = vadd.f32 %v1592_v42, %v1550_v53  ;;  %v4094_v42 = vld [vmem:[%s5437_s3 + $0x168] ss:$16 sps:$4 sm:$0xff]  }
 0x117   : > { %v1674_v50 = vpop.f32.mrf.mxu1 }
 0x119   : > { %v1676_v59 = vpop.f32.mrf.mxu1 }
 0x11b   : > { %v1678_v4 = vpop.f32.mrf.mxu1 }
 0x14c   : > { %v1629_v51 = vpop.f32.mrf.mxu0 }
 0x14d   : > { %v1630_v60 = vadd.f32 %v1629_v51, %v1587_v55  ;;  %v520_v51 = vrot.slane %v5107_v41, %v519_v45  ;;  %v4106_v55 = vld [vmem:[%s5437_s3 + $0x128] ss:$16 sps:$4 sm:$0xff]  }
 0x14e   : > { %v1631_v56 = vpop.f32.mrf.mxu0 }
 0x14f   : > { %v1632_v58 = vadd.f32 %v1631_v56, %v1589_v52  ;;  %v1673_v5 = vadd.f32 %v1672_v46, %v1630_v60  ;;  %v515_v46 = vsub.s32 2, %v5100_v21 }
 0x150   : > { %v1633_v61 = vpop.f32.mrf.mxu0 }
 0x151   : > { %v1634_v63 = vadd.f32 %v1633_v61, %v1591_v57  ;;  %v1675_v1 = vadd.f32 %v1674_v50, %v1632_v58  ;;  %v1853_v10 = vmax.f32 %v1673_v5, 0.0  ;;  %v4108_v50 = vld [vmem:[%s5437_s3 + $0x12c] ss:$16 sps:$4 sm:$0xff]   ;;  %v516_v52 = vrot.slane %v5107_v41, %v515_v46  ;;  %v4112_v41 = vld [vmem:[%s5437_s3 + $0x108] ss:$16 sps:$4 sm:$0xff]  }
 0x152   : > { %v1635_v0 = vpop.f32.mrf.mxu0  ;;  %v4114_v58 = vld [vmem:[%s5437_s3 + $0x10c] ss:$16 sps:$4 sm:$0xff]  }
 0x153   : > { %v1677_v2 = vadd.f32 %v1676_v59, %v1634_v63  ;;  %v1636_v3 = vadd.f32 %v1635_v0, %v1593_v62  ;;  %v1854_v8 = vmax.f32 %v1675_v1, 0.0 }
 0x155   : > { %v1679_v6 = vadd.f32 %v1678_v4, %v1636_v3  ;;  %v1857_v7 = vmax.f32 %v1677_v2, 0.0  ;;  %v1715_v23 = vpop.f32.mrf.mxu1 }
 0x156   : > { %v1716_v60 = vadd.f32 %v1715_v23, %v516_v52  ;;  %v4174_v23 = vld [vmem:[%s5439_s5 + $0x28] sm:$0xff]  }
 0x157   : > { %v1858_v9 = vmax.f32 %v1679_v6, 0.0  ;;  %v5118_v15 = vpack.c.bf16 %v1857_v7, %v1853_v10  ;;  %v1717_v12 = vpop.f32.mrf.mxu1 }
 0x158   : > { %v1718_v59 = vadd.f32 %v1717_v12, %v520_v51  ;;  %v4133_v12 = vld [vmem:[%s5437_s3 + $0x268] ss:$16 sps:$4 sm:$0xff]  }
 0x159   : > { %v1862_v11 = vpack.c.bf16 %v1858_v9, %v1854_v8  ;;  %v1719_v48 = vpop.f32.mrf.mxu1 }
 0x15a   : > { %v1720_v63 = vadd.f32 %v1719_v48, %v516_v52  ;;  %v4139_v48 = vld [vmem:[%s5437_s3 + $0x228] ss:$16 sps:$4 sm:$0xff]  }
 0x15b   : > { %2687 = vmatprep.mubr.bf16.mxu0 %v1862_v11  ;;  %v1721_v56 = vpop.f32.mrf.mxu1  ;;  %v4145_v52 = vld [vmem:[%s5437_s3 + $0x3e8] ss:$16 sps:$4 sm:$0xff]  }
 0x15c   : > { %2688 = vmatmul.mubr.bf16.vlgmr.msra.gmra.mxu0 %v5118_v15  ;;  %v1722_v4 = vadd.f32 %v1721_v56, %v520_v51  ;;  %v4147_v51 = vld [vmem:[%s5437_s3 + $0x3ec] ss:$16 sps:$4 sm:$0xff]  }
 0x15d   : > { %2742 = vmatpush1.bf16.msra.mxu0 %v4025_v14  ;;  %2773 = vmatprep.mubr.bf16.mxu0 %v1862_v11  ;;  %v4153_v56 = vld [vmem:[%s5437_s3 + $0x3ac] ss:$16 sps:$4 sm:$0xff]  }
 0x15e   : > { %2743 = vmatprep.subr.bf16.mxu0 %v4030_v16 }
 0x161   : > { %2744 = vmatpush1.bf16.msra.mxu0 %v4028_v17 }
 0x162   : > { %2745 = vmatprep.subr.bf16.mxu0 %v4036_v18 }
 0x165   : > { %2746 = vmatpush1.bf16.msra.mxu0 %v4034_v19 }
 0x166   : > { %2747 = vmatprep.subr.bf16.mxu0 %v4042_v20 }
 0x169   : > { %2748 = vmatpush1.bf16.msra.mxu0 %v4040_v22 }
 0x16a   : > { %2749 = vmatprep.subr.bf16.mxu0 %v4048_v24 }
 0x16d   : > { %2750 = vmatpush1.bf16.msra.mxu0 %v4046_v25 }
 0x16e   : > { %2751 = vmatprep.subr.bf16.mxu0 %v4054_v27 }
 0x171   : > { %2752 = vmatpush1.bf16.msra.mxu0 %v4052_v28 }
 0x172   : > { %2753 = vmatprep.subr.bf16.mxu0 %v4060_v29 }
 0x175   : > { %2754 = vmatpush1.bf16.msra.mxu0 %v4058_v30  ;;  %v4121_v30 = vld [vmem:[%s5437_s3 + $0x2e8] ss:$16 sps:$4 sm:$0xff]  }
 0x176   : > { %2755 = vmatprep.subr.bf16.mxu0 %v4066_v31 }
 0x179   : > { %2756 = vmatpush1.bf16.msra.mxu0 %v4064_v32  ;;  %v4126_v32 = vld [vmem:[%s5437_s3 + $0x2cc] ss:$16 sps:$4 sm:$0xff]  }
 0x17a   : > { %2757 = vmatprep.subr.bf16.mxu0 %v4072_v33  ;;  %v4170_v33 = vld [vmem:[%s5439_s5 + $0x38] sm:$0xff]  }
 0x17d   : > { %2758 = vmatpush2.bf16.msra.mxu0 %v4070_v34  ;;  %v4171_v34 = vld [vmem:[%s5439_s5 + $0x70] sm:$0xff]  }
 0x17e   : > { %2759 = vmatprep.subr.bf16.mxu0 %v4078_v35  ;;  %v4124_v35 = vld [vmem:[%s5437_s3 + $0x2c8] ss:$16 sps:$4 sm:$0xff]  }
 0x181   : > { %2760 = vmatpush2.bf16.msra.mxu0 %v4076_v36  ;;  %v4129_v36 = vld [vmem:[%s5437_s3 + $0x2ac] ss:$16 sps:$4 sm:$0xff]  }
 0x182   : > { %2761 = vmatprep.subr.bf16.mxu0 %v4084_v37  ;;  %v4172_v37 = vld [vmem:[%s5439_s5 + $0x30] sm:$0xff]  }
 0x185   : > { %2762 = vmatpush2.bf16.msra.mxu0 %v4082_v38  ;;  %v4173_v38 = vld [vmem:[%s5439_s5 + $0x68] sm:$0xff]  }
 0x186   : > { %2763 = vmatprep.subr.bf16.mxu0 %v4090_v13  ;;  %v4127_v13 = vld [vmem:[%s5437_s3 + $0x2a8] ss:$16 sps:$4 sm:$0xff]  }
 0x189   : > { %2764 = vmatpush2.bf16.msra.mxu0 %v4088_v39  ;;  %v4132_v39 = vld [vmem:[%s5437_s3 + $0x28c] ss:$16 sps:$4 sm:$0xff]  }
 0x18a   : > { %2765 = vmatprep.subr.bf16.mxu0 %v4096_v40  ;;  %v4130_v40 = vld [vmem:[%s5437_s3 + $0x288] ss:$16 sps:$4 sm:$0xff]  }
 0x18c   : > { %v1758_v44 = vpop.f32.mrf.mxu0 }
 0x18d   : > { %2766 = vmatpush2.bf16.msra.mxu0 %v4094_v42  ;;  %v1759_v1 = vadd.f32 %v1758_v44, %v1716_v60  ;;  %v4135_v42 = vld [vmem:[%s5437_s3 + $0x26c] ss:$16 sps:$4 sm:$0xff]   ;;  %v4136_v44 = vld [vmem:[%s5437_s3 + $0x248] ss:$16 sps:$4 sm:$0xff]  }
 0x18e   : > { %v1760_v49 = vpop.f32.mrf.mxu0  ;;  %2767 = vmatprep.subr.bf16.mxu0 %v4102_v43  ;;  %v4138_v43 = vld [vmem:[%s5437_s3 + $0x24c] ss:$16 sps:$4 sm:$0xff]  }
 0x18f   : > { %v1761_v0 = vadd.f32 %v1760_v49, %v1718_v59  ;;  %v4144_v49 = vld [vmem:[%s5437_s3 + $0x20c] ss:$16 sps:$4 sm:$0xff]   ;;  %v4154_v59 = vld [vmem:[%s5437_s3 + $0x388] ss:$16 sps:$4 sm:$0xff]  }
 0x190   : > { %v1762_v53 = vpop.f32.mrf.mxu0  ;;  %v4159_v60 = vld [vmem:[%s5437_s3 + $0x36c] ss:$16 sps:$4 sm:$0xff]  }
 0x191   : > { %2768 = vmatpush2.bf16.msra.mxu0 %v4100_v47  ;;  %v1763_v5 = vadd.f32 %v1762_v53, %v1720_v63  ;;  %v4141_v47 = vld [vmem:[%s5437_s3 + $0x22c] ss:$16 sps:$4 sm:$0xff]   ;;  %v4160_v63 = vld [vmem:[%s5437_s3 + $0x348] ss:$16 sps:$4 sm:$0xff]  }
 0x192   : > { %v1764_v57 = vpop.f32.mrf.mxu0  ;;  %2769 = vmatprep.subr.bf16.mxu0 %v4108_v50  ;;  %v4142_v50 = vld [vmem:[%s5437_s3 + $0x208] ss:$16 sps:$4 sm:$0xff]   ;;  %v4150_v53 = vld [vmem:[%s5437_s3 + $0x3cc] ss:$16 sps:$4 sm:$0xff]  }
 0x193   : > { %v1765_v10 = vadd.f32 %v1764_v57, %v1722_v4  ;;  %v4151_v57 = vld [vmem:[%s5437_s3 + $0x3a8] ss:$16 sps:$4 sm:$0xff]   ;;  %v4176_v4 = vld [vmem:[%s5439_s5 + $0x20] sm:$0xff]  }
 0x194   : > { %v1844_v62 = vpop.f32.mrf.mxu0 }
 0x195   : > { %v1801_v61 = vpop.f32.mrf.mxu1  ;;  %2770 = vmatpush2.bf16.msra.mxu0 %v4106_v55  ;;  %v4148_v55 = vld [vmem:[%s5437_s3 + $0x3c8] ss:$16 sps:$4 sm:$0xff]  }
 0x196   : > { %v1846_v3 = vpop.f32.mrf.mxu0  ;;  %2771 = vmatprep.subr.bf16.mxu0 %v4114_v58  ;;  %v1802_v7 = vadd.f32 %v1801_v61, %v1759_v1  ;;  %v4156_v58 = vld [vmem:[%s5437_s3 + $0x38c] ss:$16 sps:$4 sm:$0xff]   ;;  %v4157_v61 = vld [vmem:[%s5437_s3 + $0x368] ss:$16 sps:$4 sm:$0xff]  }
 0x197   : > { %v1803_v2 = vpop.f32.mrf.mxu1  ;;  %v4168_v1 = vld [vmem:[%s5437_s3 + $0x30c] ss:$16 sps:$4 sm:$0xff]  }
 0x198   : > { %v1804_v6 = vadd.f32 %v1803_v2, %v1761_v0  ;;  %v1848_v9 = vpop.f32.mrf.mxu0  ;;  %v1845_v20 = vadd.f32 %v1844_v62, %v1802_v7  ;;  %v4162_v62 = vld [vmem:[%s5437_s3 + $0x34c] ss:$16 sps:$4 sm:$0xff]   ;;  %v4166_v2 = vld [vmem:[%s5437_s3 + $0x308] ss:$16 sps:$4 sm:$0xff]   ;;  %v4179_v7 = vld [vmem:[%s5439_s5 + $0x50] sm:$0xff]  }
 0x199   : > { %v1805_v8 = vpop.f32.mrf.mxu1  ;;  %2772 = vmatpush2.bf16.msra.mxu0 %v4112_v41  ;;  %v4165_v0 = vld [vmem:[%s5437_s3 + $0x32c] ss:$16 sps:$4 sm:$0xff]   ;;  %v4163_v41 = vld [vmem:[%s5437_s3 + $0x328] ss:$16 sps:$4 sm:$0xff]  }
 0x19a   : > { %v1806_v11 = vadd.f32 %v1805_v8, %v1763_v5  ;;  %v1850_v16 = vpop.f32.mrf.mxu0  ;;  %v1847_v17 = vadd.f32 %v1846_v3, %v1804_v6  ;;  %v1855_v28 = vmax.f32 %v1845_v20, 0.0  ;;  %v4175_v3 = vld [vmem:[%s5439_s5 + $0x60] sm:$0xff]   ;;  %v4177_v5 = vld [vmem:[%s5439_s5 + $0x58] sm:$0xff]   ;;  %v4180_v8 = vld [vmem:[%s5439_s5 + $0x10] sm:$0xff]  }
 0x19b   : > { %v1807_v14 = vpop.f32.mrf.mxu1  ;;  %v4178_v6 = vld [vmem:[%s5439_s5 + $0x18] sm:$0xff]   ;;  %v4189_v20 = vld [vmem:[%s5439_s5 + $0xe8] sm:$0xff]  }
 0x19c   : > { %v1849_v18 = vadd.f32 %v1848_v9, %v1806_v11  ;;  %v1808_v19 = vadd.f32 %v1807_v14, %v1765_v10  ;;  %2774 = vmatmul.mubr.bf16.vlgmr.msra.gmra.mxu0 %v5118_v15  ;;  %v1856_v25 = vmax.f32 %v1847_v17, 0.0  ;;  %v4169_v15 = vld [vmem:[%s5439_s5 + $0x78] sm:$0xff]   ;;  %v4181_v9 = vld [vmem:[%s5439_s5 + $0x48] sm:$0xff]   ;;  %v4183_v11 = vld [vmem:[%s5439_s5 + $0x40] sm:$0xff]  }
 0x19d   : > { %3629 = vmatprep.subr.bf16.mxu0 %v4169_v15  ;;  %v4182_v10 = vld [vmem:[%s5439_s5 + $0x8] sm:$0xff]   ;;  %v4184_v14 = vld [vmem:[%s5439_s5] sm:$0xff]   ;;  %v4186_v17 = vld [vmem:[%s5439_s5 + $0xb8] sm:$0xff]  }
 0x19e   : > { %v1851_v22 = vadd.f32 %v1850_v16, %v1808_v19  ;;  %v1859_v24 = vmax.f32 %v1849_v18, 0.0  ;;  %3630 = vmatpush3.bf16.msra.mxu0 %v4170_v33  ;;  %v4185_v16 = vld [vmem:[%s5439_s5 + $0xf8] sm:$0xff]   ;;  %v4187_v18 = vld [vmem:[%s5439_s5 + $0xf0] sm:$0xff]   ;;  %v4199_v15 = vld [vmem:[%s5439_s5 + $0xc0] sm:$0xff]  }
 0x19f   : > { %3631 = vmatprep.subr.bf16.mxu0 %v4171_v34  ;;  %v4188_v19 = vld [vmem:[%s5439_s5 + $0xb0] sm:$0xff]   ;;  %v4200_v33 = vld [vmem:[%s5439_s5 + $0x80] sm:$0xff]  }
 0x1a0   : > { %v1860_v27 = vmax.f32 %v1851_v22, 0.0  ;;  %v5223_v31 = vpack.c.bf16 %v1859_v24, %v1855_v28  ;;  %v4190_v22 = vld [vmem:[%s5439_s5 + $0xa8] sm:$0xff]   ;;  %v4191_v24 = vld [vmem:[%s5439_s5 + $0xe0] sm:$0xff]   ;;  %v4194_v28 = vld [vmem:[%s5439_s5 + $0x98] sm:$0xff]  }
 0x1a2   : > { %v1864_v29 = vpack.c.bf16 %v1860_v27, %v1856_v25  ;;  %3632 = vmatpush3.bf16.msra.mxu0 %v4172_v37  ;;  %v4192_v25 = vld [vmem:[%s5439_s5 + $0xa0] sm:$0xff]   ;;  %v4193_v27 = vld [vmem:[%s5439_s5 + $0xd8] sm:$0xff]  }
 0x1a3   : > { %3633 = vmatprep.subr.bf16.mxu0 %v4173_v38 }
 0x1a4   : > { %2730 = vmatprep.mubr.bf16.mxu1 %v1864_v29 }
 0x1a5   : > { %2731 = vmatmul.mubr.bf16.vlgmr.msra.gmra.mxu1 %v5223_v31 }
 0x1a6   : > { %2785 = vmatpush1.bf16.msra.mxu1 %v4121_v30  ;;  %2816 = vmatprep.mubr.bf16.mxu1 %v1864_v29  ;;  %v4195_v29 = vld [vmem:[%s5439_s5 + $0xd0] sm:$0xff]  }
 0x1a7   : > { %2786 = vmatprep.subr.bf16.mxu1 %v4126_v32  ;;  %3634 = vmatpush3.bf16.msra.mxu0 %v4174_v23  ;;  %v4196_v30 = vld [vmem:[%s5439_s5 + $0x90] sm:$0xff]   ;;  %v4198_v32 = vld [vmem:[%s5439_s5 + $0x88] sm:$0xff]  }
 0x1a8   : > { %3635 = vmatprep.subr.bf16.mxu0 %v4175_v3 }
 0x1aa   : > { %2787 = vmatpush1.bf16.msra.mxu1 %v4124_v35 }
 0x1ab   : > { %2788 = vmatprep.subr.bf16.mxu1 %v4129_v36  ;;  %3636 = vmatpush3.bf16.msra.mxu0 %v4176_v4  ;;  %v1993_v36 = vld [vmem:[%s5438_s4] sm:$0xf] }
 0x1ac   : > { %3637 = vmatprep.subr.bf16.mxu0 %v4177_v5  ;;  %v2002_v38 = vrot.slane %v1993_v36, %v511_v26 }
 0x1ae   : > { %2789 = vmatpush1.bf16.msra.mxu1 %v4127_v13  ;;  %v1998_v13 = vrot.slane %v1993_v36, %v507_v54 }
 0x1af   : > { %2790 = vmatprep.subr.bf16.mxu1 %v4132_v39  ;;  %3638 = vmatpush3.bf16.msra.mxu0 %v4178_v6 }
 0x1b0   : > { %3639 = vmatprep.subr.bf16.mxu0 %v4179_v7 }
 0x1b2   : > { %2791 = vmatpush1.bf16.msra.mxu1 %v4130_v40 }
 0x1b3   : > { %2792 = vmatprep.subr.bf16.mxu1 %v4135_v42  ;;  %3640 = vmatpush3.bf16.msra.mxu0 %v4180_v8 }
 0x1b4   : > { %3641 = vmatprep.subr.bf16.mxu0 %v4181_v9 }
 0x1b6   : > { %2793 = vmatpush1.bf16.msra.mxu1 %v4133_v12 }
 0x1b7   : > { %2794 = vmatprep.subr.bf16.mxu1 %v4138_v43  ;;  %3642 = vmatpush3.bf16.msra.mxu0 %v4182_v10 }
 0x1b8   : > { %3643 = vmatprep.subr.bf16.mxu0 %v4183_v11 }
 0x1ba   : > { %2795 = vmatpush1.bf16.msra.mxu1 %v4136_v44 }
 0x1bb   : > { %2796 = vmatprep.subr.bf16.mxu1 %v4141_v47  ;;  %3644 = vmatpush3.bf16.msra.mxu0 %v4184_v14 }
 0x1be   : > { %2797 = vmatpush1.bf16.msra.mxu1 %v4139_v48 }
 0x1bf   : > { %2798 = vmatprep.subr.bf16.mxu1 %v4144_v49 }
 0x1c2   : > { %2799 = vmatpush1.bf16.msra.mxu1 %v4142_v50 }
 0x1c3   : > { %2800 = vmatprep.subr.bf16.mxu1 %v4147_v51 }
 0x1c6   : > { %2801 = vmatpush2.bf16.msra.mxu1 %v4145_v52 }
 0x1c7   : > { %2802 = vmatprep.subr.bf16.mxu1 %v4150_v53 }
 0x1ca   : > { %2803 = vmatpush2.bf16.msra.mxu1 %v4148_v55 }
 0x1cb   : > { %2804 = vmatprep.subr.bf16.mxu1 %v4153_v56 }
 0x1ce   : > { %2805 = vmatpush2.bf16.msra.mxu1 %v4151_v57 }
 0x1cf   : > { %2806 = vmatprep.subr.bf16.mxu1 %v4156_v58 }
 0x1d2   : > { %2807 = vmatpush2.bf16.msra.mxu1 %v4154_v59 }
 0x1d3   : > { %2808 = vmatprep.subr.bf16.mxu1 %v4159_v60 }
 0x1d6   : > { %2809 = vmatpush2.bf16.msra.mxu1 %v4157_v61  ;;  %v2010_v61 = vrot.slane %v1993_v36, %v519_v45 }
 0x1d7   : > { %2810 = vmatprep.subr.bf16.mxu1 %v4162_v62  ;;  %v2006_v62 = vrot.slane %v1993_v36, %v515_v46 }
 0x1da   : > { %2811 = vmatpush2.bf16.msra.mxu1 %v4160_v63 }
 0x1db   : > { %2812 = vmatprep.subr.bf16.mxu1 %v4165_v0 }
 0x1de   : > { %2813 = vmatpush2.bf16.msra.mxu1 %v4163_v41 }
 0x1df   : > { %2814 = vmatprep.subr.bf16.mxu1 %v4168_v1 }
 0x1e2   : > { %2815 = vmatpush2.bf16.msra.mxu1 %v4166_v2 }
 0x1e3   : > { %3651 = vmatprep.subr.bf16.mxu1 %v4185_v16 }
 0x1e5   : > { %2817 = vmatmul.mubr.bf16.vlgmr.msra.gmra.mxu1 %v5223_v31  ;;  %v4197_v31 = vld [vmem:[%s5439_s5 + $0xc8] sm:$0xff]  }
 0x1e6   : > { %3652 = vmatpush3.bf16.msra.mxu1 %v4186_v17 }
 0x1e7   : > { %3653 = vmatprep.subr.bf16.mxu1 %v4187_v18 }
 0x1ea   : > { %3654 = vmatpush3.bf16.msra.mxu1 %v4188_v19 }
 0x1eb   : > { %3655 = vmatprep.subr.bf16.mxu1 %v4189_v20 }
 0x1ee   : > { %3656 = vmatpush3.bf16.msra.mxu1 %v4190_v22 }
 0x1ef   : > { %3657 = vmatprep.subr.bf16.mxu1 %v4191_v24 }
 0x1f2   : > { %3658 = vmatpush3.bf16.msra.mxu1 %v4192_v25 }
 0x1f3   : > { %3659 = vmatprep.subr.bf16.mxu1 %v4193_v27 }
 0x1f6   : > { %3660 = vmatpush3.bf16.msra.mxu1 %v4194_v28  ;;  %v3585_v28 = vld [vmem:[%s5440_s6] ss:$0 sm:$0xff] }
 0x1f7   : > { %3661 = vmatprep.subr.bf16.mxu1 %v4195_v29 }
 0x1fa   : > { %3662 = vmatpush3.bf16.msra.mxu1 %v4196_v30 }
 0x1fb   : > { %3663 = vmatprep.subr.bf16.mxu1 %v4197_v31 }
 0x1fe   : > { %3664 = vmatpush3.bf16.msra.mxu1 %v4198_v32 }
 0x1ff   : > { %3665 = vmatprep.subr.bf16.mxu1 %v4199_v15 }
 0x202   : > { %3666 = vmatpush3.bf16.msra.mxu1 %v4200_v33 }
 0x21c   : > { %v2689_v34 = vpop.f32.mrf.mxu0 }
 0x21d   : > { %v2690_v43 = vadd.f32 %v2689_v34, %v1998_v13 }
 0x21e   : > { %v2691_v35 = vpop.f32.mrf.mxu0 }
 0x21f   : > { %v2692_v42 = vadd.f32 %v2691_v35, %v2002_v38 }
 0x220   : > { %v2693_v37 = vpop.f32.mrf.mxu0 }
 0x221   : > { %v2694_v12 = vadd.f32 %v2693_v37, %v1998_v13 }
 0x222   : > { %v2695_v23 = vpop.f32.mrf.mxu0 }
 0x223   : > { %v2696_v47 = vadd.f32 %v2695_v23, %v2002_v38 }
 0x25c   : > { %v2775_v54 = vpop.f32.mrf.mxu0 }
 0x25d   : > { %v2776_v3 = vadd.f32 %v2775_v54, %v2006_v62 }
 0x25e   : > { %v2777_v59 = vpop.f32.mrf.mxu0 }
 0x25f   : > { %v2778_v1 = vadd.f32 %v2777_v59, %v2010_v61 }
 0x260   : > { %v2779_v60 = vpop.f32.mrf.mxu0 }
 0x261   : > { %v2780_v2 = vadd.f32 %v2779_v60, %v2006_v62 }
 0x262   : > { %v2781_v0 = vpop.f32.mrf.mxu0 }
 0x263   : > { %v2782_v5 = vadd.f32 %v2781_v0, %v2010_v61 }
 0x265   : > { %v2732_v39 = vpop.f32.mrf.mxu1 }
 0x266   : > { %v2733_v50 = vadd.f32 %v2732_v39, %v2690_v43 }
 0x267   : > { %v2734_v40 = vpop.f32.mrf.mxu1 }
 0x268   : > { %v2735_v48 = vadd.f32 %v2734_v40, %v2692_v42  ;;  %v2827_v26 = vmax.f32 %v2733_v50, 0.0 }
 0x269   : > { %v2736_v44 = vpop.f32.mrf.mxu1 }
 0x26a   : > { %v2737_v49 = vadd.f32 %v2736_v44, %v2694_v12  ;;  %v2828_v55 = vmax.f32 %v2735_v48, 0.0 }
 0x26b   : > { %v2738_v51 = vpop.f32.mrf.mxu1 }
 0x26c   : > { %v2739_v52 = vadd.f32 %v2738_v51, %v2696_v47  ;;  %v2831_v53 = vmax.f32 %v2737_v49, 0.0 }
 0x26e   : > { %v2832_v56 = vmax.f32 %v2739_v52, 0.0  ;;  %v2835_v58 = vpack.c.bf16 %v2831_v53, %v2827_v26 }
 0x270   : > { %v2836_v57 = vpack.c.bf16 %v2832_v56, %v2828_v55 }
 0x272   : > { %3134 = vmatprep.mubr.bf16.mxu0 %v2836_v57 }
 0x273   : > { %3135 = vmatmul.mubr.bf16.vlgmr.msra.gmra.mxu0 %v2835_v58 }
 0x2a5   : > { %v2818_v63 = vpop.f32.mrf.mxu1 }
 0x2a6   : > { %v2819_v8 = vadd.f32 %v2818_v63, %v2776_v3 }
 0x2a7   : > { %v2820_v41 = vpop.f32.mrf.mxu1 }
 0x2a8   : > { %v2821_v6 = vadd.f32 %v2820_v41, %v2778_v1  ;;  %v2829_v45 = vmax.f32 %v2819_v8, 0.0 }
 0x2a9   : > { %v2822_v4 = vpop.f32.mrf.mxu1 }
 0x2aa   : > { %v2823_v7 = vadd.f32 %v2822_v4, %v2780_v2  ;;  %v2830_v14 = vmax.f32 %v2821_v6, 0.0 }
 0x2ab   : > { %v2824_v9 = vpop.f32.mrf.mxu1 }
 0x2ac   : > { %v2825_v10 = vadd.f32 %v2824_v9, %v2782_v5  ;;  %v2833_v11 = vmax.f32 %v2823_v7, 0.0 }
 0x2ae   : > { %v2834_v16 = vmax.f32 %v2825_v10, 0.0  ;;  %v2837_v21 = vpack.c.bf16 %v2833_v11, %v2829_v45 }
 0x2b0   : > { %v2838_v17 = vpack.c.bf16 %v2834_v16, %v2830_v14 }
 0x2b2   : > { %3175 = vmatprep.mubr.bf16.mxu1 %v2838_v17 }
 0x2b3   : > { %3176 = vmatmul.mubr.bf16.vlgmr.msra.gmra.mxu1 %v2837_v21 }
 0x333   : > { %v3645_v46 = vpop.f32.mrf.mxu0 }
 0x335   : > { %v3646_v18 = vpop.f32.mrf.mxu0 }
 0x336   : > { %v3647_v25 = vadd.f32 %v3646_v18, %v3645_v46 }
 0x337   : > { %v3648_v19 = vpop.f32.mrf.mxu0 }
 0x338   : > { %v3137_v32 = vadd.f32 %v3647_v25, %v3585_v28 }
 0x339   : > { %v3649_v20 = vpop.f32.mrf.mxu0 }
 0x33a   : > { %v3650_v27 = vadd.f32 %v3649_v20, %v3648_v19 }
 0x33c   : > { %v3140_v15 = vadd.f32 %v3650_v27, %v3585_v28 }
 0x373   : > { %v3667_v22 = vpop.f32.mrf.mxu1 }
 0x375   : > { %v3668_v24 = vpop.f32.mrf.mxu1 }
 0x376   : > { %v3669_v30 = vadd.f32 %v3668_v24, %v3667_v22 }
 0x377   : > { %v3670_v29 = vpop.f32.mrf.mxu1 }
 0x378   : > { %v3178_v34 = vadd.f32 %v3669_v30, %v3137_v32 }
 0x379   : > { %v3671_v31 = vpop.f32.mrf.mxu1 }
 0x37a   : > { %v3672_v33 = vadd.f32 %v3671_v31, %v3670_v29 }
 0x37c   : > { %v3181_v35 = vadd.f32 %v3672_v33, %v3140_v15 }
 0x37e   : > { %v3627_v36 = vpack.c.bf16 %v3181_v35, %v3178_v34 }
 0x380   : > { %3628 = vst [vmem:[%s283_s10] sm:$0xff] %v3627_v36  }
 0x381 PF: > { %s17_s24 = sadd.s32 1, %s4207_s24  }
 0x382   : > { %p14_p4 = scmp.ge.s32.totalorder %s17_s24, 4  }
 0x384   :  { %16 = sbr.rel (!%p14_p4) target bundleno = 1 (0x1), region = 78 }

</bundles_post_ra>
